<compile_context>
chip_gen: v7x
topology: tpu7x:2x2x1
jax: 0.10.0
libtpu: 0.0.40
codegen_flags: <defaults>
</compile_context>

<pallas_src>
import math
from functools import partial

import jax
import jax.numpy as jnp
from jax import lax
from jax.experimental import pallas as pl
from jax.experimental.pallas import tpu as pltpu


def _layer_norm(z, w, b, eps=1e-5):
    mu = jnp.mean(z, axis=-1, keepdims=True)
    var = jnp.mean((z - mu) ** 2, axis=-1, keepdims=True)
    return (z - mu) * lax.rsqrt(var + eps) * w + b


def _encoder_kernel(x_ref,
                    wqkv_ref, bqkv_ref, wo_ref, bo_ref, ln1w_ref, ln1b_ref,
                    w1_ref, b1_ref, w2_ref, b2_ref, ln2w_ref, ln2b_ref,
                    wout_ref, bout_ref,
                    out_ref, x_sc,
                    *, n_head, head_dim, seq_pad, seq_len, batch_tile):
    S, TB, hd, H = seq_pad, batch_tile, head_dim, n_head
    D = H * hd
    M = TB * S
    layer = pl.program_id(1)

    # first layer step for this batch tile: fold batch into the matmul M axis
    @pl.when(layer == 0)
    def _():
        x_sc[...] = x_ref[...].reshape(M, D)

    x2 = x_sc[...]                                           # [M, D] f32

    # ---- fused QKV projection: one [M, D] x [D, 3D] bf16 MXU matmul ----
    qkv = (jnp.dot(x2.astype(jnp.bfloat16), wqkv_ref[0],
                   preferred_element_type=jnp.float32) + bqkv_ref[0])
    scale = 1.0 / math.sqrt(hd)
    q = qkv[:, :D] * scale                                   # pre-scale q (bias incl.)
    k = qkv[:, D:2 * D]
    v = qkv[:, 2 * D:]

    q3 = q.reshape(TB, S, D)                                 # S is a sublane multiple
    k3 = k.reshape(TB, S, D)
    v3 = v.reshape(TB, S, D)

    # stack heads onto the leading (batch) axis -> single batched attention
    def stack_heads(t3):
        return jnp.concatenate(
            [t3[:, :, h * hd:(h + 1) * hd] for h in range(H)], axis=0)

    q_st = stack_heads(q3).astype(jnp.bfloat16)              # [TB*H, S, hd]
    k_st = stack_heads(k3).astype(jnp.bfloat16)
    v_st = stack_heads(v3).astype(jnp.bfloat16)

    # causal + key-padding mask bias, built ONCE per layer step
    row = lax.broadcasted_iota(jnp.int32, (S, S), 0)
    col = lax.broadcasted_iota(jnp.int32, (S, S), 1)
    bias = jnp.where((col <= row) & (col < seq_len), 0.0, -1e30)   # [S, S] f32

    sc = jnp.einsum('bqd,bkd->bqk', q_st, k_st,
                    preferred_element_type=jnp.float32)      # [TB*H, S, S]
    sc = sc + bias
    sc = sc - jnp.max(sc, axis=-1, keepdims=True)
    p = jnp.exp(sc)
    p = p * pl.reciprocal(jnp.sum(p, axis=-1, keepdims=True), approx=True)
    oh = jnp.einsum('bqk,bkd->bqd', p.astype(jnp.bfloat16), v_st,
                    preferred_element_type=jnp.float32)      # [TB*H, S, hd]

    # heads -> model dim through the matching rows of W_o (== concat(heads)@W_o)
    wo_l = wo_ref[0]                                         # [D, D] bf16
    attn = jnp.zeros((M, D), jnp.float32)
    for h in range(H):                                       # static, tiny
        oh_h = oh[h * TB:(h + 1) * TB].reshape(M, hd)
        attn = attn + jnp.dot(oh_h.astype(jnp.bfloat16),
                              wo_l[h * hd:(h + 1) * hd, :],
                              preferred_element_type=jnp.float32)
    attn = attn + bo_ref[0]

    x2 = _layer_norm(x2 + attn, ln1w_ref[0], ln1b_ref[0])

    # ---- feed-forward (Linear -> ReLU -> Linear), bf16 operands / f32 acc ----
    hdn = jnp.maximum(
        jnp.dot(x2.astype(jnp.bfloat16), w1_ref[0],
                preferred_element_type=jnp.float32) + b1_ref[0], 0.0)
    ff = (jnp.dot(hdn.astype(jnp.bfloat16), w2_ref[0],
                  preferred_element_type=jnp.float32) + b2_ref[0])
    x2 = _layer_norm(x2 + ff, ln2w_ref[0], ln2b_ref[0])
    x_sc[...] = x2

    # ---- final logits projection, last layer only (true out_dim lane width) ----
    @pl.when(layer == pl.num_programs(1) - 1)
    def _():
        y = (jnp.dot(x2.astype(jnp.bfloat16), wout_ref[...],
                     preferred_element_type=jnp.float32) + bout_ref[...])
        out_ref[...] = y.reshape(TB, S, -1).astype(out_ref.dtype)


def init_params(key, in_dim, max_len, attn_dim, ff_dim, n_head, n_blocks):
    # deterministic synthetic parameters (not a checkpoint load).
    # All one-time weight prep (QKV fusion, bf16 cast) happens here, not per call.
    assert in_dim == attn_dim, "reference module requires in_dim == attn_dim"
    assert attn_dim % n_head == 0
    D, F = attn_dim, ff_dim
    keys = jax.random.split(key, 10)

    def nrm(k, shape, scale=0.02, dtype=jnp.float32):
        return (scale * jax.random.normal(k, shape)).astype(dtype)

    params = dict(
        bos=jnp.zeros((1, 1, D), jnp.float32),               # nn.Parameter(zeros)
        # fused QKV projection, pre-transposed to [D, 3D]; bf16 MXU operands
        wqkv=nrm(keys[0], (n_blocks, D, 3 * D), dtype=jnp.bfloat16),
        bqkv=nrm(keys[1], (n_blocks, 1, 3 * D)),
        wo=nrm(keys[2], (n_blocks, D, D), dtype=jnp.bfloat16),
        bo=nrm(keys[3], (n_blocks, 1, D)),
        ln1w=jnp.ones((n_blocks, 1, D), jnp.float32),
        ln1b=jnp.zeros((n_blocks, 1, D), jnp.float32),
        w1=nrm(keys[4], (n_blocks, D, F), dtype=jnp.bfloat16),
        b1=nrm(keys[5], (n_blocks, 1, F)),
        w2=nrm(keys[6], (n_blocks, F, D), dtype=jnp.bfloat16),
        b2=nrm(keys[7], (n_blocks, 1, D)),
        ln2w=jnp.ones((n_blocks, 1, D), jnp.float32),
        ln2b=jnp.zeros((n_blocks, 1, D), jnp.float32),
        wout=nrm(keys[8], (D, in_dim), dtype=jnp.bfloat16),
        bout=nrm(keys[9], (1, in_dim)),
    )
    # sinusoidal PE table, [1, max_len + 1, D] (matches PositionalEncoding)
    position = jnp.arange(max_len + 1, dtype=jnp.float32)[:, None]
    div_term = jnp.exp(jnp.arange(0, D, 2, dtype=jnp.float32)
                       * (-math.log(10000.0) / D))
    pe = jnp.zeros((max_len + 1, D), jnp.float32)
    pe = pe.at[:, 0::2].set(jnp.sin(position * div_term))
    pe = pe.at[:, 1::2].set(jnp.cos(position * div_term))
    params["pe"] = pe[None]
    return params


def _pick_batch_tile(B, S_pad, D, F, H, out_dim, layer_bytes,
                     budget_bytes=20 * 1024 * 1024):
    """Largest divisor of B whose VMEM footprint fits the budget, preferring an
    even number of batch tiles (v7x: 2 TensorCores share the parallel axis)."""
    def est(tb):
        m = tb * S_pad
        act_elems = (2 * m * D            # double-buffered input block
                     + 2 * m * out_dim    # double-buffered output block
                     + m * D              # x_sc scratch
                     + m * 3 * D          # fused qkv
                     + 3 * m * D          # stacked q/k/v
                     + 2 * tb * H * S_pad * S_pad   # scores + probs
                     + 2 * m * D          # head outputs + attn
                     + m * F)             # FFN hidden
        return int(1.5 * 4 * act_elems) + 2 * layer_bytes
    divisors = [t for t in range(1, B + 1) if B % t == 0]
    fitting = [t for t in divisors if est(t) <= budget_bytes] or [1]
    even = [t for t in fitting if B // t >= 2 and (B // t) % 2 == 0]
    atleast2 = [t for t in fitting if B // t >= 2]
    if even:
        return max(even)
    if atleast2:
        return max(atleast2)
    return max(fitting)


def transformer_trajectory_encoder(x, params, *, n_head, n_blocks, batch_tile=None):
    B, L, D = x.shape
    assert D % n_head == 0
    S = L + 1
    S_pad = ((S + 7) // 8) * 8                       # sublane-aligned sequence
    head_dim = D // n_head
    out_dim = params["wout"].shape[-1]
    F = params["w1"].shape[-1]

    # glue in plain JAX: BOS concat + PE add (dropout p=0 is the identity),
    # then zero-pad the sequence up to a sublane multiple.
    x_full = (jnp.concatenate(
        [jnp.broadcast_to(params["bos"], (B, 1, D)), x], axis=1)
        + params["pe"][:, :S, :])
    if S_pad > S:
        x_full = jnp.pad(x_full, ((0, 0), (0, S_pad - S), (0, 0)))

    layer_names = ["wqkv", "bqkv", "wo", "bo", "ln1w", "ln1b",
                   "w1", "b1", "w2", "b2", "ln2w", "ln2b"]
    layer_weights = [params[n] for n in layer_names]
    layer_bytes = sum(int(w[0].size) * w.dtype.itemsize for w in layer_weights)

    TB = batch_tile if batch_tile is not None else _pick_batch_tile(
        B, S_pad, D, F, n_head, out_dim, layer_bytes)
    assert B % TB == 0

    def layer_spec(arr):
        # one layer's slab per grid step -> weights streamed / prefetched over
        # the (innermost) layer axis; VMEM footprint independent of n_blocks.
        return pl.BlockSpec((1,) + arr.shape[1:], lambda b, l: (l, 0, 0))

    kernel = partial(_encoder_kernel, n_head=n_head, head_dim=head_dim,
                     seq_pad=S_pad, seq_len=S, batch_tile=TB)

    out = pl.pallas_call(
        kernel,
        out_shape=jax.ShapeDtypeStruct((B, S_pad, out_dim), jnp.float32),
        grid_spec=pltpu.PrefetchScalarGridSpec(
            num_scalar_prefetch=0,
            grid=(B // TB, n_blocks),                # layer axis innermost
            in_specs=[pl.BlockSpec((TB, S_pad, D), lambda b, l: (b, 0, 0))]
                     + [layer_spec(w) for w in layer_weights]
                     + [pl.BlockSpec(params["wout"].shape, lambda b, l: (0, 0)),
                        pl.BlockSpec(params["bout"].shape, lambda b, l: (0, 0))],
            out_specs=pl.BlockSpec((TB, S_pad, out_dim), lambda b, l: (b, 0, 0)),
            scratch_shapes=[pltpu.VMEM((TB * S_pad, D), jnp.float32)],
        ),
        compiler_params=pltpu.CompilerParams(
            dimension_semantics=("parallel", "arbitrary"),
            vmem_limit_bytes=32 * 1024 * 1024),
    )(x_full, *layer_weights, params["wout"], params["bout"])

    return out[:, :S, :]                             # drop padded query rows only


if __name__ == "__main__":
    IN_DIM = 32          # == attn_dim, required by the reference module
    MAX_LEN = 16
    ATTN_DIM, FF_DIM, N_HEAD = 32, 64, 4
    N_BLOCKS = 2
    B, L = 2, 8

    key = jax.random.PRNGKey(0)
    pkey, xkey = jax.random.split(key)
    params = init_params(pkey, IN_DIM, MAX_LEN, ATTN_DIM, FF_DIM, N_HEAD, N_BLOCKS)
    x = jax.random.normal(xkey, (B, L, IN_DIM), dtype=jnp.float32)

    out = transformer_trajectory_encoder(x, params, n_head=N_HEAD, n_blocks=N_BLOCKS)
    out = jax.block_until_ready(out)
    assert out.shape == (B, L + 1, IN_DIM), out.shape
    assert bool(jnp.all(jnp.isfinite(out)))
    print("KERNEL_OK")
</pallas_src>

<mosaic_0001>
module attributes {stable_mosaic.version = 11 : i64} {
  func.func @_encoder_kernel(%arg0: i32, %arg1: i32, %arg2: memref<1x16x32xf32, #tpu.memory_space<vmem>>, %arg3: memref<1x32x96xbf16, #tpu.memory_space<vmem>>, %arg4: memref<1x1x96xf32, #tpu.memory_space<vmem>>, %arg5: memref<1x32x32xbf16, #tpu.memory_space<vmem>>, %arg6: memref<1x1x32xf32, #tpu.memory_space<vmem>>, %arg7: memref<1x1x32xf32, #tpu.memory_space<vmem>>, %arg8: memref<1x1x32xf32, #tpu.memory_space<vmem>>, %arg9: memref<1x32x64xbf16, #tpu.memory_space<vmem>>, %arg10: memref<1x1x64xf32, #tpu.memory_space<vmem>>, %arg11: memref<1x64x32xbf16, #tpu.memory_space<vmem>>, %arg12: memref<1x1x32xf32, #tpu.memory_space<vmem>>, %arg13: memref<1x1x32xf32, #tpu.memory_space<vmem>>, %arg14: memref<1x1x32xf32, #tpu.memory_space<vmem>>, %arg15: memref<32x32xbf16, #tpu.memory_space<vmem>>, %arg16: memref<1x32xf32, #tpu.memory_space<vmem>>, %arg17: memref<1x16x32xf32, #tpu.memory_space<vmem>>, %arg18: memref<16x32xf32, #tpu.memory_space<vmem>>) attributes {dimension_semantics = [#tpu.dimension_semantics<parallel>, #tpu.dimension_semantics<arbitrary>], iteration_bounds = array<i64: 2, 2>, scalar_prefetch = 0 : i64, scratch_operands = 1 : i64, tpu.core_type = #tpu.core_type<tc>, window_params = [{transform_indices = @transform_0, window_bounds = array<i64: 1, 16, 32>}, {transform_indices = @transform_1, window_bounds = array<i64: 1, 32, 96>}, {transform_indices = @transform_2, window_bounds = array<i64: 1, 1, 96>}, {transform_indices = @transform_3, window_bounds = array<i64: 1, 32, 32>}, {transform_indices = @transform_4, window_bounds = array<i64: 1, 1, 32>}, {transform_indices = @transform_5, window_bounds = array<i64: 1, 1, 32>}, {transform_indices = @transform_6, window_bounds = array<i64: 1, 1, 32>}, {transform_indices = @transform_7, window_bounds = array<i64: 1, 32, 64>}, {transform_indices = @transform_8, window_bounds = array<i64: 1, 1, 64>}, {transform_indices = @transform_9, window_bounds = array<i64: 1, 64, 32>}, {transform_indices = @transform_10, window_bounds = array<i64: 1, 1, 32>}, {transform_indices = @transform_11, window_bounds = array<i64: 1, 1, 32>}, {transform_indices = @transform_12, window_bounds = array<i64: 1, 1, 32>}, {pipeline_mode = #tpu.pipeline_mode<synchronous>, transform_indices = @transform_13, window_bounds = array<i64: 32, 32>}, {pipeline_mode = #tpu.pipeline_mode<synchronous>, transform_indices = @transform_14, window_bounds = array<i64: 1, 32>}, {transform_indices = @transform_15, window_bounds = array<i64: 1, 16, 32>}]} {
    %c0_i32 = arith.constant 0 : i32
    %0 = arith.cmpi eq, %arg1, %c0_i32 : i32
    %1 = arith.extui %0 : i1 to i32
    %c0_i32_0 = arith.constant 0 : i32
    %2 = arith.cmpi ne, %1, %c0_i32_0 : i32
    scf.if %2 {
      %c0_66 = arith.constant 0 : index
      %c0_67 = arith.constant 0 : index
      %c0_68 = arith.constant 0 : index
      %170 = vector.load %arg2[%c0_66, %c0_67, %c0_68] : memref<1x16x32xf32, #tpu.memory_space<vmem>>, vector<1x16x32xf32>
      %171 = vector.shape_cast %170 : vector<1x16x32xf32> to vector<16x32xf32>
      %c0_69 = arith.constant 0 : index
      %c0_70 = arith.constant 0 : index
      %172 = vector.load %arg18[%c0_69, %c0_70] : memref<16x32xf32, #tpu.memory_space<vmem>>, vector<16x32xf32>
      tpu.vector_store %arg18[%c0_69, %c0_70], %171 {strides = array<i32>} : memref<16x32xf32, #tpu.memory_space<vmem>>, vector<16x32xf32>,
    } else {
    }
    %c0 = arith.constant 0 : index
    %c0_1 = arith.constant 0 : index
    %3 = vector.load %arg18[%c0, %c0_1] : memref<16x32xf32, #tpu.memory_space<vmem>>, vector<16x32xf32>
    %4 = arith.truncf %3 : vector<16x32xf32> to vector<16x32xbf16>
    %c0_2 = arith.constant 0 : index
    %c0_3 = arith.constant 0 : index
    %c0_4 = arith.constant 0 : index
    %5 = vector.load %arg3[%c0_2, %c0_3, %c0_4] : memref<1x32x96xbf16, #tpu.memory_space<vmem>>, vector<1x32x96xbf16>
    %6 = vector.shape_cast %5 : vector<1x32x96xbf16> to vector<32x96xbf16>
    %cst = arith.constant dense<0.000000e+00> : vector<16x96xf32>
    %7 = tpu.matmul %4, %6, %cst {dimension_numbers = #tpu.dot_dimension_numbers<[1], [0], [0], [1], [0, 0, 1, 1], [], []>} : vector<16x32xbf16>, vector<32x96xbf16>, vector<16x96xf32> -> vector<16x96xf32>
    %c0_5 = arith.constant 0 : index
    %c0_6 = arith.constant 0 : index
    %c0_7 = arith.constant 0 : index
    %8 = vector.load %arg4[%c0_5, %c0_6, %c0_7] : memref<1x1x96xf32, #tpu.memory_space<vmem>>, vector<1x1x96xf32>
    %9 = vector.shape_cast %8 : vector<1x1x96xf32> to vector<1x96xf32>
    %10 = vector.broadcast %9 : vector<1x96xf32> to vector<16x96xf32>
    %11 = arith.addf %7, %10 : vector<16x96xf32>
    %12 = vector.extract_strided_slice %11 {offsets = [0, 0], sizes = [16, 32], strides = [1, 1]} : vector<16x96xf32> to vector<16x32xf32>
    %cst_8 = arith.constant 0.353553385 : f32
    %13 = vector.broadcast %cst_8 : f32 to vector<16x32xf32>
    %14 = arith.mulf %12, %13 : vector<16x32xf32>
    %15 = vector.extract_strided_slice %11 {offsets = [0, 32], sizes = [16, 32], strides = [1, 1]} : vector<16x96xf32> to vector<16x32xf32>
    %16 = vector.extract_strided_slice %11 {offsets = [0, 64], sizes = [16, 32], strides = [1, 1]} : vector<16x96xf32> to vector<16x32xf32>
    %17 = vector.shape_cast %14 : vector<16x32xf32> to vector<1x16x32xf32>
    %18 = vector.shape_cast %15 : vector<16x32xf32> to vector<1x16x32xf32>
    %19 = vector.shape_cast %16 : vector<16x32xf32> to vector<1x16x32xf32>
    %20 = vector.extract_strided_slice %17 {offsets = [0, 0, 0], sizes = [1, 16, 8], strides = [1, 1, 1]} : vector<1x16x32xf32> to vector<1x16x8xf32>
    %21 = vector.extract_strided_slice %17 {offsets = [0, 0, 8], sizes = [1, 16, 8], strides = [1, 1, 1]} : vector<1x16x32xf32> to vector<1x16x8xf32>
    %22 = vector.extract_strided_slice %17 {offsets = [0, 0, 16], sizes = [1, 16, 8], strides = [1, 1, 1]} : vector<1x16x32xf32> to vector<1x16x8xf32>
    %23 = vector.extract_strided_slice %17 {offsets = [0, 0, 24], sizes = [1, 16, 8], strides = [1, 1, 1]} : vector<1x16x32xf32> to vector<1x16x8xf32>
    %24 = tpu.concatenate %20, %21, %22, %23 in 0 : vector<1x16x8xf32>, vector<1x16x8xf32>, vector<1x16x8xf32>, vector<1x16x8xf32> -> vector<4x16x8xf32>
    %25 = arith.truncf %24 : vector<4x16x8xf32> to vector<4x16x8xbf16>
    %26 = vector.extract_strided_slice %18 {offsets = [0, 0, 0], sizes = [1, 16, 8], strides = [1, 1, 1]} : vector<1x16x32xf32> to vector<1x16x8xf32>
    %27 = vector.extract_strided_slice %18 {offsets = [0, 0, 8], sizes = [1, 16, 8], strides = [1, 1, 1]} : vector<1x16x32xf32> to vector<1x16x8xf32>
    %28 = vector.extract_strided_slice %18 {offsets = [0, 0, 16], sizes = [1, 16, 8], strides = [1, 1, 1]} : vector<1x16x32xf32> to vector<1x16x8xf32>
    %29 = vector.extract_strided_slice %18 {offsets = [0, 0, 24], sizes = [1, 16, 8], strides = [1, 1, 1]} : vector<1x16x32xf32> to vector<1x16x8xf32>
    %30 = tpu.concatenate %26, %27, %28, %29 in 0 : vector<1x16x8xf32>, vector<1x16x8xf32>, vector<1x16x8xf32>, vector<1x16x8xf32> -> vector<4x16x8xf32>
    %31 = arith.truncf %30 : vector<4x16x8xf32> to vector<4x16x8xbf16>
    %32 = vector.extract_strided_slice %19 {offsets = [0, 0, 0], sizes = [1, 16, 8], strides = [1, 1, 1]} : vector<1x16x32xf32> to vector<1x16x8xf32>
    %33 = vector.extract_strided_slice %19 {offsets = [0, 0, 8], sizes = [1, 16, 8], strides = [1, 1, 1]} : vector<1x16x32xf32> to vector<1x16x8xf32>
    %34 = vector.extract_strided_slice %19 {offsets = [0, 0, 16], sizes = [1, 16, 8], strides = [1, 1, 1]} : vector<1x16x32xf32> to vector<1x16x8xf32>
    %35 = vector.extract_strided_slice %19 {offsets = [0, 0, 24], sizes = [1, 16, 8], strides = [1, 1, 1]} : vector<1x16x32xf32> to vector<1x16x8xf32>
    %36 = tpu.concatenate %32, %33, %34, %35 in 0 : vector<1x16x8xf32>, vector<1x16x8xf32>, vector<1x16x8xf32>, vector<1x16x8xf32> -> vector<4x16x8xf32>
    %37 = arith.truncf %36 : vector<4x16x8xf32> to vector<4x16x8xbf16>
    %38 = tpu.iota {dimensions = array<i32: 0>} : vector<16x16xi32>
    %39 = tpu.iota {dimensions = array<i32: 1>} : vector<16x16xi32>
    %40 = arith.cmpi sle, %39, %38 : vector<16x16xi32>
    %c9_i32 = arith.constant 9 : i32
    %41 = vector.broadcast %c9_i32 : i32 to vector<16x16xi32>
    %42 = arith.cmpi slt, %39, %41 : vector<16x16xi32>
    %43 = arith.andi %40, %42 : vector<16x16xi1>
    %cst_9 = arith.constant 0.000000e+00 : f32
    %cst_10 = arith.constant -1.000000e+30 : f32
    %44 = vector.broadcast %cst_9 : f32 to vector<16x16xf32>
    %45 = vector.broadcast %cst_10 : f32 to vector<16x16xf32>
    %46 = arith.select %43, %44, %45 : vector<16x16xi1>, vector<16x16xf32>
    "tpu.trace_start"() <{level = 10 : i32, message = "bqd,bkd->bqk"}> : () -> ()
    %cst_11 = arith.constant dense<0.000000e+00> : vector<4x16x16xf32>
    %47 = tpu.matmul %25, %31, %cst_11 {dimension_numbers = #tpu.dot_dimension_numbers<[2], [2], [1], [1], [0, 0, 0, 1, 1, 1], [0], [0]>} : vector<4x16x8xbf16>, vector<4x16x8xbf16>, vector<4x16x16xf32> -> vector<4x16x16xf32>
    "tpu.trace_stop"() : () -> ()
    %48 = vector.shape_cast %46 : vector<16x16xf32> to vector<1x16x16xf32>
    %49 = vector.broadcast %48 : vector<1x16x16xf32> to vector<4x16x16xf32>
    %50 = arith.addf %47, %49 : vector<4x16x16xf32>
    %cst_12 = arith.constant dense<0xFF800000> : vector<4x16xf32>
    %51 = vector.multi_reduction <maximumf>, %50, %cst_12 [2] : vector<4x16x16xf32> to vector<4x16xf32>
    %52 = vector.shape_cast %51 : vector<4x16xf32> to vector<4x16x1xf32>
    %53 = vector.broadcast %52 : vector<4x16x1xf32> to vector<4x16x16xf32>
    %54 = arith.subf %50, %53 : vector<4x16x16xf32>
    %55 = math.exp %54 : vector<4x16x16xf32>
    %cst_13 = arith.constant dense<0.000000e+00> : vector<4x16xf32>
    %56 = vector.multi_reduction <add>, %55, %cst_13 [2] : vector<4x16x16xf32> to vector<4x16xf32>
    %57 = vector.shape_cast %56 : vector<4x16xf32> to vector<4x16x1xf32>
    %58 = tpu.reciprocal %57 {approx = true} : vector<4x16x1xf32> -> vector<4x16x1xf32>
    %59 = vector.broadcast %58 : vector<4x16x1xf32> to vector<4x16x16xf32>
    %60 = arith.mulf %55, %59 : vector<4x16x16xf32>
    %61 = arith.truncf %60 : vector<4x16x16xf32> to vector<4x16x16xbf16>
    "tpu.trace_start"() <{level = 10 : i32, message = "bqk,bkd->bqd"}> : () -> ()
    %cst_14 = arith.constant dense<0.000000e+00> : vector<4x16x8xf32>
    %62 = tpu.matmul %61, %37, %cst_14 {dimension_numbers = #tpu.dot_dimension_numbers<[2], [1], [1], [2], [0, 0, 0, 1, 1, 2], [0], [0]>} : vector<4x16x16xbf16>, vector<4x16x8xbf16>, vector<4x16x8xf32> -> vector<4x16x8xf32>
    "tpu.trace_stop"() : () -> ()
    %c0_15 = arith.constant 0 : index
    %c0_16 = arith.constant 0 : index
    %c0_17 = arith.constant 0 : index
    %63 = vector.load %arg5[%c0_15, %c0_16, %c0_17] : memref<1x32x32xbf16, #tpu.memory_space<vmem>>, vector<1x32x32xbf16>
    %64 = vector.shape_cast %63 : vector<1x32x32xbf16> to vector<32x32xbf16>
    %cst_18 = arith.constant 0.000000e+00 : f32
    %65 = vector.broadcast %cst_18 : f32 to vector<16x32xf32>
    %66 = vector.extract_strided_slice %62 {offsets = [0, 0, 0], sizes = [1, 16, 8], strides = [1, 1, 1]} : vector<4x16x8xf32> to vector<1x16x8xf32>
    %67 = vector.shape_cast %66 : vector<1x16x8xf32> to vector<16x8xf32>
    %68 = arith.truncf %67 : vector<16x8xf32> to vector<16x8xbf16>
    %69 = vector.extract_strided_slice %64 {offsets = [0, 0], sizes = [8, 32], strides = [1, 1]} : vector<32x32xbf16> to vector<8x32xbf16>
    %cst_19 = arith.constant dense<0.000000e+00> : vector<16x32xf32>
    %70 = tpu.matmul %68, %69, %cst_19 {dimension_numbers = #tpu.dot_dimension_numbers<[1], [0], [0], [1], [0, 0, 1, 1], [], []>} : vector<16x8xbf16>, vector<8x32xbf16>, vector<16x32xf32> -> vector<16x32xf32>
    %71 = arith.addf %65, %70 : vector<16x32xf32>
    %72 = vector.extract_strided_slice %62 {offsets = [1, 0, 0], sizes = [1, 16, 8], strides = [1, 1, 1]} : vector<4x16x8xf32> to vector<1x16x8xf32>
    %73 = vector.shape_cast %72 : vector<1x16x8xf32> to vector<16x8xf32>
    %74 = arith.truncf %73 : vector<16x8xf32> to vector<16x8xbf16>
    %75 = vector.extract_strided_slice %64 {offsets = [8, 0], sizes = [8, 32], strides = [1, 1]} : vector<32x32xbf16> to vector<8x32xbf16>
    %cst_20 = arith.constant dense<0.000000e+00> : vector<16x32xf32>
    %76 = tpu.matmul %74, %75, %cst_20 {dimension_numbers = #tpu.dot_dimension_numbers<[1], [0], [0], [1], [0, 0, 1, 1], [], []>} : vector<16x8xbf16>, vector<8x32xbf16>, vector<16x32xf32> -> vector<16x32xf32>
    %77 = arith.addf %71, %76 : vector<16x32xf32>
    %78 = vector.extract_strided_slice %62 {offsets = [2, 0, 0], sizes = [1, 16, 8], strides = [1, 1, 1]} : vector<4x16x8xf32> to vector<1x16x8xf32>
    %79 = vector.shape_cast %78 : vector<1x16x8xf32> to vector<16x8xf32>
    %80 = arith.truncf %79 : vector<16x8xf32> to vector<16x8xbf16>
    %81 = vector.extract_strided_slice %64 {offsets = [16, 0], sizes = [8, 32], strides = [1, 1]} : vector<32x32xbf16> to vector<8x32xbf16>
    %cst_21 = arith.constant dense<0.000000e+00> : vector<16x32xf32>
    %82 = tpu.matmul %80, %81, %cst_21 {dimension_numbers = #tpu.dot_dimension_numbers<[1], [0], [0], [1], [0, 0, 1, 1], [], []>} : vector<16x8xbf16>, vector<8x32xbf16>, vector<16x32xf32> -> vector<16x32xf32>
    %83 = arith.addf %77, %82 : vector<16x32xf32>
    %84 = vector.extract_strided_slice %62 {offsets = [3, 0, 0], sizes = [1, 16, 8], strides = [1, 1, 1]} : vector<4x16x8xf32> to vector<1x16x8xf32>
    %85 = vector.shape_cast %84 : vector<1x16x8xf32> to vector<16x8xf32>
    %86 = arith.truncf %85 : vector<16x8xf32> to vector<16x8xbf16>
    %87 = vector.extract_strided_slice %64 {offsets = [24, 0], sizes = [8, 32], strides = [1, 1]} : vector<32x32xbf16> to vector<8x32xbf16>
    %cst_22 = arith.constant dense<0.000000e+00> : vector<16x32xf32>
    %88 = tpu.matmul %86, %87, %cst_22 {dimension_numbers = #tpu.dot_dimension_numbers<[1], [0], [0], [1], [0, 0, 1, 1], [], []>} : vector<16x8xbf16>, vector<8x32xbf16>, vector<16x32xf32> -> vector<16x32xf32>
    %89 = arith.addf %83, %88 : vector<16x32xf32>
    %c0_23 = arith.constant 0 : index
    %c0_24 = arith.constant 0 : index
    %c0_25 = arith.constant 0 : index
    %90 = vector.load %arg6[%c0_23, %c0_24, %c0_25] : memref<1x1x32xf32, #tpu.memory_space<vmem>>, vector<1x1x32xf32>
    %91 = vector.shape_cast %90 : vector<1x1x32xf32> to vector<1x32xf32>
    %92 = vector.broadcast %91 : vector<1x32xf32> to vector<16x32xf32>
    %93 = arith.addf %89, %92 : vector<16x32xf32>
    %94 = arith.addf %3, %93 : vector<16x32xf32>
    %c0_26 = arith.constant 0 : index
    %c0_27 = arith.constant 0 : index
    %c0_28 = arith.constant 0 : index
    %95 = vector.load %arg7[%c0_26, %c0_27, %c0_28] : memref<1x1x32xf32, #tpu.memory_space<vmem>>, vector<1x1x32xf32>
    %96 = vector.shape_cast %95 : vector<1x1x32xf32> to vector<1x32xf32>
    %c0_29 = arith.constant 0 : index
    %c0_30 = arith.constant 0 : index
    %c0_31 = arith.constant 0 : index
    %97 = vector.load %arg8[%c0_29, %c0_30, %c0_31] : memref<1x1x32xf32, #tpu.memory_space<vmem>>, vector<1x1x32xf32>
    %98 = vector.shape_cast %97 : vector<1x1x32xf32> to vector<1x32xf32>
    %cst_32 = arith.constant dense<0.000000e+00> : vector<16xf32>
    %99 = vector.multi_reduction <add>, %94, %cst_32 [1] : vector<16x32xf32> to vector<16xf32>
    %100 = vector.shape_cast %99 : vector<16xf32> to vector<16x1xf32>
    %cst_33 = arith.constant 3.200000e+01 : f32
    %101 = vector.broadcast %cst_33 : f32 to vector<16x1xf32>
    %102 = arith.divf %100, %101 : vector<16x1xf32>
    %103 = vector.broadcast %102 : vector<16x1xf32> to vector<16x32xf32>
    %104 = arith.subf %94, %103 : vector<16x32xf32>
    %105 = arith.mulf %104, %104 : vector<16x32xf32>
    %cst_34 = arith.constant dense<0.000000e+00> : vector<16xf32>
    %106 = vector.multi_reduction <add>, %105, %cst_34 [1] : vector<16x32xf32> to vector<16xf32>
    %107 = vector.shape_cast %106 : vector<16xf32> to vector<16x1xf32>
    %cst_35 = arith.constant 3.200000e+01 : f32
    %108 = vector.broadcast %cst_35 : f32 to vector<16x1xf32>
    %109 = arith.divf %107, %108 : vector<16x1xf32>
    %110 = vector.broadcast %102 : vector<16x1xf32> to vector<16x32xf32>
    %111 = arith.subf %94, %110 : vector<16x32xf32>
    %cst_36 = arith.constant 9.99999974E-6 : f32
    %112 = vector.broadcast %cst_36 : f32 to vector<16x1xf32>
    %113 = arith.addf %109, %112 : vector<16x1xf32>
    %114 = math.rsqrt %113 : vector<16x1xf32>
    %115 = vector.broadcast %114 : vector<16x1xf32> to vector<16x32xf32>
    %116 = arith.mulf %111, %115 : vector<16x32xf32>
    %117 = vector.broadcast %96 : vector<1x32xf32> to vector<16x32xf32>
    %118 = arith.mulf %116, %117 : vector<16x32xf32>
    %119 = vector.broadcast %98 : vector<1x32xf32> to vector<16x32xf32>
    %120 = arith.addf %118, %119 : vector<16x32xf32>
    %121 = arith.truncf %120 : vector<16x32xf32> to vector<16x32xbf16>
    %c0_37 = arith.constant 0 : index
    %c0_38 = arith.constant 0 : index
    %c0_39 = arith.constant 0 : index
    %122 = vector.load %arg9[%c0_37, %c0_38, %c0_39] : memref<1x32x64xbf16, #tpu.memory_space<vmem>>, vector<1x32x64xbf16>
    %123 = vector.shape_cast %122 : vector<1x32x64xbf16> to vector<32x64xbf16>
    %cst_40 = arith.constant dense<0.000000e+00> : vector<16x64xf32>
    %124 = tpu.matmul %121, %123, %cst_40 {dimension_numbers = #tpu.dot_dimension_numbers<[1], [0], [0], [1], [0, 0, 1, 1], [], []>} : vector<16x32xbf16>, vector<32x64xbf16>, vector<16x64xf32> -> vector<16x64xf32>
    %c0_41 = arith.constant 0 : index
    %c0_42 = arith.constant 0 : index
    %c0_43 = arith.constant 0 : index
    %125 = vector.load %arg10[%c0_41, %c0_42, %c0_43] : memref<1x1x64xf32, #tpu.memory_space<vmem>>, vector<1x1x64xf32>
    %126 = vector.shape_cast %125 : vector<1x1x64xf32> to vector<1x64xf32>
    %127 = vector.broadcast %126 : vector<1x64xf32> to vector<16x64xf32>
    %128 = arith.addf %124, %127 : vector<16x64xf32>
    %cst_44 = arith.constant 0.000000e+00 : f32
    %129 = vector.broadcast %cst_44 : f32 to vector<16x64xf32>
    %130 = arith.maximumf %128, %129 : vector<16x64xf32>
    %131 = arith.truncf %130 : vector<16x64xf32> to vector<16x64xbf16>
    %c0_45 = arith.constant 0 : index
    %c0_46 = arith.constant 0 : index
    %c0_47 = arith.constant 0 : index
    %132 = vector.load %arg11[%c0_45, %c0_46, %c0_47] : memref<1x64x32xbf16, #tpu.memory_space<vmem>>, vector<1x64x32xbf16>
    %133 = vector.shape_cast %132 : vector<1x64x32xbf16> to vector<64x32xbf16>
    %cst_48 = arith.constant dense<0.000000e+00> : vector<16x32xf32>
    %134 = tpu.matmul %131, %133, %cst_48 {dimension_numbers = #tpu.dot_dimension_numbers<[1], [0], [0], [1], [0, 0, 1, 1], [], []>} : vector<16x64xbf16>, vector<64x32xbf16>, vector<16x32xf32> -> vector<16x32xf32>
    %c0_49 = arith.constant 0 : index
    %c0_50 = arith.constant 0 : index
    %c0_51 = arith.constant 0 : index
    %135 = vector.load %arg12[%c0_49, %c0_50, %c0_51] : memref<1x1x32xf32, #tpu.memory_space<vmem>>, vector<1x1x32xf32>
    %136 = vector.shape_cast %135 : vector<1x1x32xf32> to vector<1x32xf32>
    %137 = vector.broadcast %136 : vector<1x32xf32> to vector<16x32xf32>
    %138 = arith.addf %134, %137 : vector<16x32xf32>
    %139 = arith.addf %120, %138 : vector<16x32xf32>
    %c0_52 = arith.constant 0 : index
    %c0_53 = arith.constant 0 : index
    %c0_54 = arith.constant 0 : index
    %140 = vector.load %arg13[%c0_52, %c0_53, %c0_54] : memref<1x1x32xf32, #tpu.memory_space<vmem>>, vector<1x1x32xf32>
    %141 = vector.shape_cast %140 : vector<1x1x32xf32> to vector<1x32xf32>
    %c0_55 = arith.constant 0 : index
    %c0_56 = arith.constant 0 : index
    %c0_57 = arith.constant 0 : index
    %142 = vector.load %arg14[%c0_55, %c0_56, %c0_57] : memref<1x1x32xf32, #tpu.memory_space<vmem>>, vector<1x1x32xf32>
    %143 = vector.shape_cast %142 : vector<1x1x32xf32> to vector<1x32xf32>
    %cst_58 = arith.constant dense<0.000000e+00> : vector<16xf32>
    %144 = vector.multi_reduction <add>, %139, %cst_58 [1] : vector<16x32xf32> to vector<16xf32>
    %145 = vector.shape_cast %144 : vector<16xf32> to vector<16x1xf32>
    %cst_59 = arith.constant 3.200000e+01 : f32
    %146 = vector.broadcast %cst_59 : f32 to vector<16x1xf32>
    %147 = arith.divf %145, %146 : vector<16x1xf32>
    %148 = vector.broadcast %147 : vector<16x1xf32> to vector<16x32xf32>
    %149 = arith.subf %139, %148 : vector<16x32xf32>
    %150 = arith.mulf %149, %149 : vector<16x32xf32>
    %cst_60 = arith.constant dense<0.000000e+00> : vector<16xf32>
    %151 = vector.multi_reduction <add>, %150, %cst_60 [1] : vector<16x32xf32> to vector<16xf32>
    %152 = vector.shape_cast %151 : vector<16xf32> to vector<16x1xf32>
    %cst_61 = arith.constant 3.200000e+01 : f32
    %153 = vector.broadcast %cst_61 : f32 to vector<16x1xf32>
    %154 = arith.divf %152, %153 : vector<16x1xf32>
    %155 = vector.broadcast %147 : vector<16x1xf32> to vector<16x32xf32>
    %156 = arith.subf %139, %155 : vector<16x32xf32>
    %cst_62 = arith.constant 9.99999974E-6 : f32
    %157 = vector.broadcast %cst_62 : f32 to vector<16x1xf32>
    %158 = arith.addf %154, %157 : vector<16x1xf32>
    %159 = math.rsqrt %158 : vector<16x1xf32>
    %160 = vector.broadcast %159 : vector<16x1xf32> to vector<16x32xf32>
    %161 = arith.mulf %156, %160 : vector<16x32xf32>
    %162 = vector.broadcast %141 : vector<1x32xf32> to vector<16x32xf32>
    %163 = arith.mulf %161, %162 : vector<16x32xf32>
    %164 = vector.broadcast %143 : vector<1x32xf32> to vector<16x32xf32>
    %165 = arith.addf %163, %164 : vector<16x32xf32>
    %c0_63 = arith.constant 0 : index
    %c0_64 = arith.constant 0 : index
    %166 = vector.load %arg18[%c0_63, %c0_64] : memref<16x32xf32, #tpu.memory_space<vmem>>, vector<16x32xf32>
    tpu.vector_store %arg18[%c0_63, %c0_64], %165 {strides = array<i32>} : memref<16x32xf32, #tpu.memory_space<vmem>>, vector<16x32xf32>,
    %c1_i32 = arith.constant 1 : i32
    %167 = arith.cmpi eq, %arg1, %c1_i32 : i32
    %168 = arith.extui %167 : i1 to i32
    %c0_i32_65 = arith.constant 0 : i32
    %169 = arith.cmpi ne, %168, %c0_i32_65 : i32
    scf.if %169 {
      %170 = arith.truncf %165 : vector<16x32xf32> to vector<16x32xbf16>
      %c0_66 = arith.constant 0 : index
      %c0_67 = arith.constant 0 : index
      %171 = vector.load %arg15[%c0_66, %c0_67] : memref<32x32xbf16, #tpu.memory_space<vmem>>, vector<32x32xbf16>
      %cst_68 = arith.constant dense<0.000000e+00> : vector<16x32xf32>
      %172 = tpu.matmul %170, %171, %cst_68 {dimension_numbers = #tpu.dot_dimension_numbers<[1], [0], [0], [1], [0, 0, 1, 1], [], []>} : vector<16x32xbf16>, vector<32x32xbf16>, vector<16x32xf32> -> vector<16x32xf32>
      %c0_69 = arith.constant 0 : index
      %c0_70 = arith.constant 0 : index
      %173 = vector.load %arg16[%c0_69, %c0_70] : memref<1x32xf32, #tpu.memory_space<vmem>>, vector<1x32xf32>
      %174 = vector.broadcast %173 : vector<1x32xf32> to vector<16x32xf32>
      %175 = arith.addf %172, %174 : vector<16x32xf32>
      %176 = vector.shape_cast %175 : vector<16x32xf32> to vector<1x16x32xf32>
      %c0_71 = arith.constant 0 : index
      %c0_72 = arith.constant 0 : index
      %c0_73 = arith.constant 0 : index
      %177 = vector.load %arg17[%c0_71, %c0_72, %c0_73] : memref<1x16x32xf32, #tpu.memory_space<vmem>>, vector<1x16x32xf32>
      tpu.vector_store %arg17[%c0_71, %c0_72, %c0_73], %176 {strides = array<i32>} : memref<1x16x32xf32, #tpu.memory_space<vmem>>, vector<1x16x32xf32>,
    } else {
    }
    return
  }
  func.func @transform_0(%arg0: i32, %arg1: i32) -> (i32, i32, i32) {
    %c0_i32 = arith.constant 0 : i32
    %c0_i32_0 = arith.constant 0 : i32
    %c0_i32_1 = arith.constant 0 : i32
    return %arg0, %c0_i32, %c0_i32_0 : i32, i32, i32
  }
  func.func @transform_1(%arg0: i32, %arg1: i32) -> (i32, i32, i32) {
    %c0_i32 = arith.constant 0 : i32
    %c0_i32_0 = arith.constant 0 : i32
    %c0_i32_1 = arith.constant 0 : i32
    return %arg1, %c0_i32, %c0_i32_0 : i32, i32, i32
  }
  func.func @transform_2(%arg0: i32, %arg1: i32) -> (i32, i32, i32) {
    %c0_i32 = arith.constant 0 : i32
    %c0_i32_0 = arith.constant 0 : i32
    %c0_i32_1 = arith.constant 0 : i32
    return %arg1, %c0_i32, %c0_i32_0 : i32, i32, i32
  }
  func.func @transform_3(%arg0: i32, %arg1: i32) -> (i32, i32, i32) {
    %c0_i32 = arith.constant 0 : i32
    %c0_i32_0 = arith.constant 0 : i32
    %c0_i32_1 = arith.constant 0 : i32
    return %arg1, %c0_i32, %c0_i32_0 : i32, i32, i32
  }
  func.func @transform_4(%arg0: i32, %arg1: i32) -> (i32, i32, i32) {
    %c0_i32 = arith.constant 0 : i32
    %c0_i32_0 = arith.constant 0 : i32
    %c0_i32_1 = arith.constant 0 : i32
    return %arg1, %c0_i32, %c0_i32_0 : i32, i32, i32
  }
  func.func @transform_5(%arg0: i32, %arg1: i32) -> (i32, i32, i32) {
    %c0_i32 = arith.constant 0 : i32
    %c0_i32_0 = arith.constant 0 : i32
    %c0_i32_1 = arith.constant 0 : i32
    return %arg1, %c0_i32, %c0_i32_0 : i32, i32, i32
  }
  func.func @transform_6(%arg0: i32, %arg1: i32) -> (i32, i32, i32) {
    %c0_i32 = arith.constant 0 : i32
    %c0_i32_0 = arith.constant 0 : i32
    %c0_i32_1 = arith.constant 0 : i32
    return %arg1, %c0_i32, %c0_i32_0 : i32, i32, i32
  }
  func.func @transform_7(%arg0: i32, %arg1: i32) -> (i32, i32, i32) {
    %c0_i32 = arith.constant 0 : i32
    %c0_i32_0 = arith.constant 0 : i32
    %c0_i32_1 = arith.constant 0 : i32
    return %arg1, %c0_i32, %c0_i32_0 : i32, i32, i32
  }
  func.func @transform_8(%arg0: i32, %arg1: i32) -> (i32, i32, i32) {
    %c0_i32 = arith.constant 0 : i32
    %c0_i32_0 = arith.constant 0 : i32
    %c0_i32_1 = arith.constant 0 : i32
    return %arg1, %c0_i32, %c0_i32_0 : i32, i32, i32
  }
  func.func @transform_9(%arg0: i32, %arg1: i32) -> (i32, i32, i32) {
    %c0_i32 = arith.constant 0 : i32
    %c0_i32_0 = arith.constant 0 : i32
    %c0_i32_1 = arith.constant 0 : i32
    return %arg1, %c0_i32, %c0_i32_0 : i32, i32, i32
  }
  func.func @transform_10(%arg0: i32, %arg1: i32) -> (i32, i32, i32) {
    %c0_i32 = arith.constant 0 : i32
    %c0_i32_0 = arith.constant 0 : i32
    %c0_i32_1 = arith.constant 0 : i32
    return %arg1, %c0_i32, %c0_i32_0 : i32, i32, i32
  }
  func.func @transform_11(%arg0: i32, %arg1: i32) -> (i32, i32, i32) {
    %c0_i32 = arith.constant 0 : i32
    %c0_i32_0 = arith.constant 0 : i32
    %c0_i32_1 = arith.constant 0 : i32
    return %arg1, %c0_i32, %c0_i32_0 : i32, i32, i32
  }
  func.func @transform_12(%arg0: i32, %arg1: i32) -> (i32, i32, i32) {
    %c0_i32 = arith.constant 0 : i32
    %c0_i32_0 = arith.constant 0 : i32
    %c0_i32_1 = arith.constant 0 : i32
    return %arg1, %c0_i32, %c0_i32_0 : i32, i32, i32
  }
  func.func @transform_13(%arg0: i32, %arg1: i32) -> (i32, i32) {
    %c0_i32 = arith.constant 0 : i32
    %c0_i32_0 = arith.constant 0 : i32
    %c0_i32_1 = arith.constant 0 : i32
    return %c0_i32, %c0_i32_0 : i32, i32
  }
  func.func @transform_14(%arg0: i32, %arg1: i32) -> (i32, i32) {
    %c0_i32 = arith.constant 0 : i32
    %c0_i32_0 = arith.constant 0 : i32
    %c0_i32_1 = arith.constant 0 : i32
    return %c0_i32, %c0_i32_0 : i32, i32
  }
  func.func @transform_15(%arg0: i32, %arg1: i32) -> (i32, i32, i32) {
    %c0_i32 = arith.constant 0 : i32
    %c0_i32_0 = arith.constant 0 : i32
    %c0_i32_1 = arith.constant 0 : i32
    return %arg0, %c0_i32, %c0_i32_0 : i32, i32, i32
  }
}

</mosaic_0001>

<bundles_post_ra>
// kernel: tpu_custom_call.1
= control target key start
LH: loop header
LB: loop body
LE: loop exit
PB: predicated region body
PF: predicated region fallthrough
CT: control target
= control target key end

     0   :  { %s3978_s0 = inlined_call_operand.vmem [shape: f32[2,16,32], index: 0, kind: input, shape index: {}]   ;;  %s3979_s1 = inlined_call_operand.vmem [shape: bf16[2,32,96], index: 1, kind: input, shape index: {}]   ;;  %s3980_s2 = inlined_call_operand.hbm [shape: f32[2,1,96], index: 2, kind: input, shape index: {}]   ;;  %s3981_s3 = inlined_call_operand.vmem [shape: bf16[2,32,32], index: 3, kind: input, shape index: {}]   ;;  %s3982_s4 = inlined_call_operand.hbm [shape: f32[2,1,32], index: 4, kind: input, shape index: {}]   ;;  %s3983_s5 = inlined_call_operand.hbm [shape: f32[2,1,32], index: 5, kind: input, shape index: {}]   ;;  %s3984_s6 = inlined_call_operand.hbm [shape: f32[2,1,32], index: 6, kind: input, shape index: {}]   ;;  %s3985_s7 = inlined_call_operand.hbm [shape: bf16[2,32,64], index: 7, kind: input, shape index: {}]   ;;  %s3986_s8 = inlined_call_operand.hbm [shape: f32[2,1,64], index: 8, kind: input, shape index: {}]   ;;  %s3987_s9 = inlined_call_operand.vmem [shape: bf16[2,64,32], index: 9, kind: input, shape index: {}]   ;;  %s3988_s10 = inlined_call_operand.hbm [shape: f32[2,1,32], index: 10, kind: input, shape index: {}]   ;;  %s3989_s11 = inlined_call_operand.hbm [shape: f32[2,1,32], index: 11, kind: input, shape index: {}]   ;;  %s3990_s12 = inlined_call_operand.hbm [shape: f32[2,1,32], index: 12, kind: input, shape index: {}]   ;;  %s3991_s13 = inlined_call_operand.vmem [shape: bf16[32,32], index: 13, kind: input, shape index: {}]   ;;  %s3992_s14 = inlined_call_operand.vmem [shape: f32[1,32], index: 14, kind: input, shape index: {}]   ;;  %s3993_s15 = inlined_call_operand.hbm [shape: f32[2,16,32], index: 15, kind: output, shape index: {}]  }
   0x1   :  { %4014 = sst [smem:[#allocation37_spill]] %s3978_s0 }
   0x2   :  { %4015 = sst [smem:[#allocation38_spill]] %s3979_s1 }
   0x3   :  { %4016 = sst [smem:[#allocation39_spill]] %s3980_s2 }
   0x4   :  { %4017 = sst [smem:[#allocation40_spill]] %s3981_s3 }
   0x5   :  { %4018 = sst [smem:[#allocation41_spill]] %s3982_s4 }
   0x6   :  { %4019 = sst [smem:[#allocation42_spill]] %s3983_s5 }
   0x7   :  { %4020 = sst [smem:[#allocation43_spill]] %s3984_s6 }
   0x8   :  { %4021 = sst [smem:[#allocation44_spill]] %s3985_s7 }
   0x9   :  { %4022 = sst [smem:[#allocation45_spill]] %s3986_s8 }
   0xa   :  { %4023 = sst [smem:[#allocation46_spill]] %s3987_s9 }
   0xb   :  { %4024 = sst [smem:[#allocation47_spill]] %s3988_s10 }
   0xc   :  { %4025 = sst [smem:[#allocation48_spill]] %s3989_s11 }
   0xd   :  { %4026 = sst [smem:[#allocation49_spill]] %s3991_s13 }
   0xe   :  { %4027 = sst [smem:[#allocation50_spill]] %s3992_s14 }
   0xf   :  { %4028 = sst [smem:[#allocation51_spill]] %s3993_s15 }
  0x10   :  { %20 = vsyncpa [#allocation4], 0 }
  0x11   :  { %22 = vsyncpa [#allocation4 + $0x1], 0 }
  0x12   :  { %23 = vsyncpa [#allocation7], 0 }
  0x13   :  { %25 = vsyncpa [#allocation7 + $0x1], 0 }
  0x14   :  { %26 = vsyncpa [#allocation10], 0 }
  0x15   :  { %28 = vsyncpa [#allocation10 + $0x1], 0 }
  0x16   :  { %29 = vsyncpa [#allocation13], 0 }
  0x17   :  { %31 = vsyncpa [#allocation13 + $0x1], 0 }
  0x18   :  { %32 = vsyncpa [#allocation16], 0 }
  0x19   :  { %34 = vsyncpa [#allocation16 + $0x1], 0 }
  0x1a   :  { %35 = vsyncpa [#allocation5], 0 }
  0x1b   :  { %37 = vsyncpa [#allocation5 + $0x1], 0  ;;  %s3288_s18 = smov 0   ;;  %s3290_s19 = smov 0  }
  0x1c   :  { %s3292_s20 = smov 0   ;;  %s3294_s21 = smov 0  }
  0x1d   :  { %s3296_s22 = smov 0   ;;  %s3298_s23 = smov 0  }
  0x1e   :  { %s3300_s24 = smov 0   ;;  %s3302_s25 = smov 0  }
  0x1f   :  { %s3304_s26 = smov 0   ;;  %s3306_s27 = smov 0  }
  0x20   :  { %s3308_s28 = smov 0  }
  0x21 LB: > { %4029 = sst [smem:[#allocation25_spill]] %s3142_s18  ;;  %s3342_s29 = sadd.s32 4294967295, %s3182_s28   ;;  %s3182_s28 = sphi %s3308_s28, %s43_s28   ;;  %s3178_s27 = sphi %s3306_s27, %s4104_s27   ;;  %s3174_s26 = sphi %s3304_s26, %s4110_s26   ;;  %s3170_s25 = sphi %s3302_s25, %s4102_s25   ;;  %s3166_s24 = sphi %s3300_s24, %s4109_s24   ;;  %s3162_s23 = sphi %s3298_s23, %s4101_s23   ;;  %s3158_s22 = sphi %s3296_s22, %s4108_s22   ;;  %s3154_s21 = sphi %s3294_s21, %s4107_s21   ;;  %s3150_s20 = sphi %s3292_s20, %s4099_s20   ;;  %s3146_s19 = sphi %s3290_s19, %s4106_s19   ;;  %s3142_s18 = sphi %s3288_s18, %s4105_s18  }
  0x22   : > { %4030 = sst [smem:[#allocation26_spill]] %s3150_s20  ;;  %s2319_s30 = sadd.s32 4294967294, %s3182_s28  }
  0x23   : > { %4031 = sst [smem:[#allocation27_spill]] %s3162_s23  ;;  %s52_s16 = sadd.s32 1, %s3174_s26 }
  0x24   : > { %4032 = sst [smem:[#allocation28_spill]] %s3166_s24  ;;  %s55_s17 = sadd.s32 1, %s3178_s27 }
  0x25   : > { %4033 = sst [smem:[#allocation29_spill]] %s3178_s27  ;;  %p53_p0 = scmp.ge.s32.totalorder %s52_s16, 2 }
  0x26   : > { %4034 = sst [smem:[#allocation30_spill]] %s3182_s28  ;;  %s114_s15 = sadd.s32 1, %s3162_s23 }
  0x27   : > { %p121_p1 = scmp.ne.s32.totalorder %s3162_s23, %s3158_s22  ;;  %p122_p2 = scmp.eq.s32.totalorder %s3182_s28, 0 }
  0x28   : > { %s4112_s16 = smov (%p53_p0, %s52_s16), 0  ;;  %s4114_s17 = smov (!%p53_p0, %s55_s17), %s3178_s27 }
  0x29   : > { %4035 = sst [smem:[#allocation31_spill]] %s4112_s16  ;;  %s111_s14 = ssub.s32 %s3174_s26, %s4112_s16 }
  0x2a   : > { %p3356_p3 = por %p122_p2, %p121_p1  ;;  %p57_p4 = scmp.ge.s32.totalorder %s4114_s17, 2 }
  0x2b   : > { %p112_p5 = scmp.eq.s32.totalorder %s111_s14, 0  ;;  %p127_p6 = scmp.ne.s32.totalorder %s3158_s22, %s3154_s21 }
  0x2c   : > { %p128_p7 = scmp.eq.s32.totalorder %s3342_s29, 0  ;;  %s4116_s17 = smov (%p57_p4, %s4114_s17), 0 }
  0x2d   : > { %4037 = sst [smem:[#allocation32_spill]] %s4116_s17  ;;  %s439_s3 = ssub.s32 %s3178_s27, %s4116_s17 }
  0x2e   : > { %s3365_s9 = scalar_select %p112_p5, %s3162_s23, %s114_s15  }
  0x2f   : > { %p3367_p8 = por %p128_p7, %p127_p6  ;;  %p440_p9 = scmp.eq.s32.totalorder %s439_s3, 0 }
  0x30   : > { %4038 = sst [smem:[#allocation33_spill]] %s3365_s9  ;;  %s442_s1 = sadd.s32 1, %s3150_s20 }
  0x31   : > { %s4039_s16 = scalar_select %p3367_p8, 1, 0 }
  0x32   : > { %p452_p10 = scmp.ne.s32.totalorder %s3150_s20, %s3146_s19  ;;  %p453_p11 = scmp.eq.s32.totalorder %s3342_s29, 3 }
  0x33   : > { %s3378_s14 = scalar_select %p440_p9, %s3150_s20, %s442_s1  }
  0x34   : > { %p3380_p12 = por %p453_p11, %p452_p10  ;;  %p458_p13 = scmp.ne.s32.totalorder %s3146_s19, %s3142_s18 }
  0x35   : > { %4040 = sst [smem:[#allocation34_spill]] %s3378_s14  ;;  %p459_p0 = scmp.eq.s32.totalorder %s2319_s30, 3 }
  0x36   : > { %s4041_s21 = scalar_select %p3380_p12, 1, 0 }
  0x37   : > { %p2590_p1 = scmp.lt.s32.totalorder %s3182_s28, 4  ;;  %s3388_s15 = sand.u32 1, %s3162_s23  }
  0x38   : > { %4042 = sst [smem:[#allocation35_spill]] %s4041_s21  ;;  %p3390_p2 = por %p459_p0, %p458_p13 }
  0x39   : > { %s3395_s3 = sshll.u32 %s3174_s26, 4  ;;  %p3399_p4 = pnand %p2590_p1, %p3356_p3 }
  0x3a   : > { %s4043_s17 = scalar_select %p3390_p2, 1, 0 }
  0x3b   : > { %s4045_s1 = scalar_select %p3399_p4, 1, 0 }
  0x3c   : > { %4044 = sst [smem:[#allocation36_spill]] %s4043_s17  ;;  %s3404_s27 = sand.u32 1, %s3182_s28  }
  0x3d   : > { %s4046_s4 = sld [smem:[#allocation41_spill]]  ;;  %s529_s14 = scalar_lea.vmem [#allocation6], %s3388_s15 }
  0x3e   : > { %s536_s13 = sshll.u32 %s529_s14, 4  ;;  %p3422_p7 = pneg %p3399_p4  ;;  %s3414_s13 = int_to_ptr.vmem [resolvable:$true] %s536_s13 }
  0x43   : > { %s3410_s23 = scalar_lea.hbm %s4046_s4, %s3395_s3  ;;  %s2779_s14 = scalar_lea.hbm %s4046_s4, 32 }
  0x44   : > { %s2774_s17 = scalar_lea.hbm %s3410_s23, 16  ;;  %p2780_p11 = scmp.lt.u32.totalorder %s3410_s23, %s4046_s4 }
  0x45   : > { %p2775_p6 = scmp.ne.s32.totalorder %s3410_s23, %s2774_s17  ;;  %p2781_p13 = scmp.lt.u32.totalorder %s2779_s14, %s2774_s17 }
  0x46   : > { %p2783_p1 = scmp.lt.u32.totalorder %s2774_s17, %s3410_s23 }
  0x47   : > { %p2777_p9 = pnand %p3422_p7, %p2775_p6  ;;  %p2782_p0 = por %p2781_p13, %p2780_p11 }
  0x49   : > { %p2778_p10 = pneg %p2777_p9  ;;  %p2784_p5 = por %p2783_p1, %p2782_p0 }
  0x4b   : > { %p2785_p3 = pnand %p2784_p5, %p2778_p10 }
  0x4d   : > { %2788 = shalt.err (!%p2785_p3)
}
  0x4e   : > { %s2789_s20 = scalar_lea.vmem %s3414_s13, 16  ;;  %s3184_s9 = smov [#allocation6]  }
  0x4f   : > { %p2790_p6 = scmp.ne.s32.totalorder %s3414_s13, %s2789_s20  ;;  %s2794_s30 = sshll.u32 %s3184_s9, 4  ;;  %s2795_s30 = int_to_ptr.vmem [resolvable:$false] %s2794_s30 }
  0x50   : > { %s2796_s0 = scalar_lea.vmem %s2795_s30, 32  ;;  %p2797_p12 = scmp.lt.s32.totalorder %s3414_s13, %s2795_s30 }
  0x51   : > { %p2792_p9 = pnand %p2790_p6, %p3422_p7  ;;  %p2798_p8 = scmp.lt.s32.totalorder %s2796_s0, %s2789_s20 }
  0x53   : > { %p2793_p2 = pneg %p2792_p9  ;;  %p2799_p11 = por %p2798_p8, %p2797_p12 }
  0x55   : > { %p2800_p13 = pnand %p2799_p11, %p2793_p2 }
  0x57   : > { %2803 = shalt.err (!%p2800_p13)
}
  0x58   : > { %s4048_s17 = scalar_lea.sflag [#allocation7], %s3404_s27  ;;  %p4049_p5 = scmp.lt.s32.totalorder %s3182_s28, 5 }
  0x59   : > { %2564 = dma.hbm_to_vmem [thread:$0]  (!%p3399_p4), %s3410_s23, 16, %s3414_s13, %s4048_s17  }
  0x5a   : > { %p4050_p3 = scmp.ge.s32.totalorder %s3182_s28, 1  ;;  %s4052_s6 = sld [smem:[#allocation43_spill]] }
  0x5b   : > { %s563_s30 = scalar_lea.vmem [#allocation9], %s3388_s15 }
  0x5c   : > { %p3451_p10 = pnand %p4050_p3, %p4049_p5  ;;  %s570_s0 = sshll.u32 %s563_s30, 4  ;;  %s571_s0 = int_to_ptr.vmem [resolvable:$true] %s570_s0 }
  0x5e   : > { %s4051_s20 = scalar_select %p3451_p10, 1, 0 }
  0x60   : > { %s3459_s9 = scalar_lea.hbm %s4052_s6, %s3395_s3  ;;  %s2809_s28 = scalar_lea.hbm %s4052_s6, 32 }
  0x61   : > { %s2804_s23 = scalar_lea.hbm %s3459_s9, 16  ;;  %p2810_p0 = scmp.lt.u32.totalorder %s3459_s9, %s4052_s6 }
  0x62   : > { %p2805_p8 = scmp.ne.s32.totalorder %s3459_s9, %s2804_s23  ;;  %p2811_p1 = scmp.lt.u32.totalorder %s2809_s28, %s2804_s23 }
  0x63   : > { %p2813_p9 = scmp.lt.u32.totalorder %s2804_s23, %s3459_s9 }
  0x64   : > { %p2807_p12 = pnand %p2805_p8, %p3422_p7  ;;  %p2812_p6 = por %p2811_p1, %p2810_p0 }
  0x66   : > { %p2808_p2 = pneg %p2807_p12  ;;  %p2814_p11 = por %p2813_p9, %p2812_p6 }
  0x68   : > { %p2815_p13 = pnand %p2814_p11, %p2808_p2 }
  0x6a   : > { %2818 = shalt.err (!%p2815_p13)
}
  0x6b   : > { %s2819_s30 = scalar_lea.vmem %s571_s0, 16  ;;  %s3185_s4 = smov [#allocation9]  }
  0x6c   : > { %p2820_p5 = scmp.ne.s32.totalorder %s571_s0, %s2819_s30  ;;  %s2824_s24 = sshll.u32 %s3185_s4, 4  ;;  %s2825_s24 = int_to_ptr.vmem [resolvable:$false] %s2824_s24 }
  0x6d   : > { %s2826_s13 = scalar_lea.vmem %s2825_s24, 32  ;;  %p2827_p12 = scmp.lt.s32.totalorder %s571_s0, %s2825_s24 }
  0x6e   : > { %p2822_p3 = pnand %p2820_p5, %p3422_p7  ;;  %p2828_p10 = scmp.lt.s32.totalorder %s2826_s13, %s2819_s30 }
  0x70   : > { %p2823_p8 = pneg %p2822_p3  ;;  %p2829_p4 = por %p2828_p10, %p2827_p12 }
  0x72   : > { %p2830_p0 = pnand %p2829_p4, %p2823_p8 }
  0x74   : > { %2833 = shalt.err (!%p2830_p0)
}
  0x75   : > { %p4053_p1 = scmp.ne.s32.totalorder %s4045_s1, 0  ;;  %s4054_s28 = scalar_lea.sflag [#allocation10], %s3404_s27 }
  0x76   : > { %s4055_s8 = sld [smem:[#allocation45_spill]]  ;;  %s601_s24 = scalar_lea.vmem [#allocation12], %s3388_s15 }
  0x77   : > { %2570 = dma.hbm_to_vmem [thread:$0]  (!%p4053_p1), %s3459_s9, 16, %s571_s0, %s4054_s28  }
  0x78   : > { %s608_s21 = sshll.u32 %s601_s24, 4  ;;  %s609_s21 = int_to_ptr.vmem [resolvable:$true] %s608_s21 }
  0x7c   : > { %s3486_s4 = scalar_lea.hbm %s4055_s8, %s3395_s3  ;;  %s2839_s0 = scalar_lea.hbm %s4055_s8, 32 }
  0x7d   : > { %s2834_s30 = scalar_lea.hbm %s3486_s4, 16  ;;  %p2840_p6 = scmp.lt.u32.totalorder %s3486_s4, %s4055_s8 }
  0x7e   : > { %p2835_p4 = scmp.ne.s32.totalorder %s3486_s4, %s2834_s30  ;;  %p2841_p9 = scmp.lt.u32.totalorder %s2839_s0, %s2834_s30 }
  0x7f   : > { %p2843_p13 = scmp.lt.u32.totalorder %s2834_s30, %s3486_s4 }
  0x80   : > { %p2837_p10 = pnand %p2835_p4, %p3422_p7  ;;  %p2842_p11 = por %p2841_p9, %p2840_p6 }
  0x82   : > { %p2838_p2 = pneg %p2837_p10  ;;  %p2844_p5 = por %p2843_p13, %p2842_p11 }
  0x84   : > { %p2845_p3 = pnand %p2844_p5, %p2838_p2 }
  0x86   : > { %2848 = shalt.err (!%p2845_p3)
}
  0x87   : > { %s2849_s17 = scalar_lea.vmem %s609_s21, 16  ;;  %s3186_s24 = smov [#allocation12]  }
  0x88   : > { %p2850_p8 = scmp.ne.s32.totalorder %s609_s21, %s2849_s17  ;;  %s2854_s14 = sshll.u32 %s3186_s24, 4  ;;  %s2855_s14 = int_to_ptr.vmem [resolvable:$false] %s2854_s14 }
  0x89   : > { %s2856_s13 = scalar_lea.vmem %s2855_s14, 32  ;;  %p2857_p4 = scmp.lt.s32.totalorder %s609_s21, %s2855_s14 }
  0x8a   : > { %p2852_p12 = pnand %p2850_p8, %p3422_p7  ;;  %p2858_p10 = scmp.lt.s32.totalorder %s2856_s13, %s2849_s17 }
  0x8c   : > { %p2853_p0 = pneg %p2852_p12  ;;  %p2859_p1 = por %p2858_p10, %p2857_p4 }
  0x8e   : > { %p2860_p6 = pnand %p2859_p1, %p2853_p0 }
  0x90   : > { %2863 = shalt.err (!%p2860_p6)
}
  0x91   : > { %p4056_p9 = scmp.ne.s32.totalorder %s4045_s1, 0  ;;  %s4057_s30 = scalar_lea.sflag [#allocation13], %s3404_s27 }
  0x92   : > { %s4058_s11 = sld [smem:[#allocation48_spill]]  ;;  %s643_s14 = scalar_lea.vmem [#allocation15], %s3388_s15 }
  0x93   : > { %2576 = dma.hbm_to_vmem [thread:$0]  (!%p4056_p9), %s3486_s4, 16, %s609_s21, %s4057_s30  }
  0x94   : > { %s650_s23 = sshll.u32 %s643_s14, 4  ;;  %s651_s23 = int_to_ptr.vmem [resolvable:$true] %s650_s23 }
  0x98   : > { %s3513_s28 = scalar_lea.hbm %s4058_s11, %s3395_s3  ;;  %s2869_s21 = scalar_lea.hbm %s4058_s11, 32 }
  0x99   : > { %s2864_s24 = scalar_lea.hbm %s3513_s28, 16  ;;  %p2870_p13 = scmp.lt.u32.totalorder %s3513_s28, %s4058_s11 }
  0x9a   : > { %p2865_p1 = scmp.ne.s32.totalorder %s3513_s28, %s2864_s24  ;;  %p2871_p5 = scmp.lt.u32.totalorder %s2869_s21, %s2864_s24 }
  0x9b   : > { %p2873_p8 = scmp.lt.u32.totalorder %s2864_s24, %s3513_s28 }
  0x9c   : > { %p2867_p2 = pnand %p2865_p1, %p3422_p7  ;;  %p2872_p3 = por %p2871_p5, %p2870_p13 }
  0x9e   : > { %p2868_p11 = pneg %p2867_p2  ;;  %p2874_p12 = por %p2873_p8, %p2872_p3 }
  0xa0   : > { %p2875_p0 = pnand %p2874_p12, %p2868_p11 }
  0xa2   : > { %2878 = shalt.err (!%p2875_p0)
}
  0xa3   : > { %s2879_s0 = scalar_lea.vmem %s651_s23, 16  ;;  %s3187_s14 = smov [#allocation15]  }
  0xa4   : > { %p2880_p4 = scmp.ne.s32.totalorder %s651_s23, %s2879_s0  ;;  %s2884_s17 = sshll.u32 %s3187_s14, 4  ;;  %s2885_s17 = int_to_ptr.vmem [resolvable:$false] %s2884_s17 }
  0xa5   : > { %s2886_s13 = scalar_lea.vmem %s2885_s17, 32  ;;  %p2887_p1 = scmp.lt.s32.totalorder %s651_s23, %s2885_s17 }
  0xa6   : > { %p2882_p10 = pnand %p2880_p4, %p3422_p7  ;;  %p2888_p2 = scmp.lt.s32.totalorder %s2886_s13, %s2879_s0 }
  0xa8   : > { %p2883_p6 = pneg %p2882_p10  ;;  %p2889_p9 = por %p2888_p2, %p2887_p1 }
  0xaa   : > { %p2890_p5 = pnand %p2889_p9, %p2883_p6 }
  0xac   : > { %2893 = shalt.err (!%p2890_p5)
}
  0xad   : > { %p4059_p13 = scmp.ne.s32.totalorder %s4045_s1, 0  ;;  %s4060_s24 = scalar_lea.sflag [#allocation16], %s3404_s27 }
  0xae   : > { %s4061_s2 = sld [smem:[#allocation39_spill]]  ;;  %s504_s17 = scalar_lea.vmem [#allocation3], %s3388_s15 }
  0xaf   : > { %2582 = dma.hbm_to_vmem [thread:$0]  (!%p4059_p13), %s3513_s28, 16, %s651_s23, %s4060_s24  }
  0xb0   : > { %s511_s9 = sshll.u32 %s504_s17, 4  ;;  %s502_s0 = scalar_lea.sflag [#allocation4], %s3388_s15  ;;  %s512_s9 = int_to_ptr.vmem [resolvable:$true] %s511_s9 }
  0xb4   : > { %s3540_s30 = scalar_lea.hbm %s4061_s2, %s3395_s3  ;;  %s2899_s23 = scalar_lea.hbm %s4061_s2, 32 }
  0xb5   : > { %s2894_s14 = scalar_lea.hbm %s3540_s30, 16  ;;  %p2900_p8 = scmp.lt.u32.totalorder %s3540_s30, %s4061_s2 }
  0xb6   : > { %p2895_p9 = scmp.ne.s32.totalorder %s3540_s30, %s2894_s14  ;;  %p2901_p12 = scmp.lt.u32.totalorder %s2899_s23, %s2894_s14 }
  0xb7   : > { %p2903_p4 = scmp.lt.u32.totalorder %s2894_s14, %s3540_s30 }
  0xb8   : > { %p2897_p11 = pnand %p2895_p9, %p3422_p7  ;;  %p2902_p0 = por %p2901_p12, %p2900_p8 }
  0xba   : > { %p2898_p3 = pneg %p2897_p11  ;;  %p2904_p10 = por %p2903_p4, %p2902_p0 }
  0xbc   : > { %p2905_p6 = pnand %p2904_p10, %p2898_p3 }
  0xbe   : > { %2908 = shalt.err (!%p2905_p6)
}
  0xbf   : > { %s2909_s21 = scalar_lea.vmem %s512_s9, 16  ;;  %s3188_s17 = smov [#allocation3]  }
  0xc0   : > { %p2910_p1 = scmp.ne.s32.totalorder %s512_s9, %s2909_s21  ;;  %s2914_s6 = sshll.u32 %s3188_s17, 4  ;;  %s2915_s6 = int_to_ptr.vmem [resolvable:$false] %s2914_s6 }
  0xc1   : > { %s2916_s13 = scalar_lea.vmem %s2915_s6, 32  ;;  %p2917_p9 = scmp.lt.s32.totalorder %s512_s9, %s2915_s6 }
  0xc2   : > { %p2912_p2 = pnand %p2910_p1, %p3422_p7  ;;  %p2918_p11 = scmp.lt.s32.totalorder %s2916_s13, %s2909_s21 }
  0xc4   : > { %p2913_p5 = pneg %p2912_p2  ;;  %p2919_p13 = por %p2918_p11, %p2917_p9 }
  0xc6   : > { %p2920_p8 = pnand %p2919_p13, %p2913_p5 }
  0xc8   : > { %2923 = shalt.err (!%p2920_p8)
}
  0xc9   : > { %p4062_p12 = scmp.ne.s32.totalorder %s4045_s1, 0  ;;  %s4063_s5 = sld [smem:[#allocation42_spill]] }
  0xca   : > { %s546_s6 = scalar_lea.vmem [#allocation8], %s3388_s15  ;;  %s2326_s4 = sshll.u32 %s3388_s15, 4 }
  0xcb   : > { %2561 = dma.hbm_to_vmem [thread:$0]  (!%p4062_p12), %s3540_s30, 16, %s512_s9, %s502_s0  }
  0xcc   : > { %s553_s24 = sshll.u32 %s546_s6, 4  ;;  %s554_s24 = int_to_ptr.vmem [resolvable:$true] %s553_s24 }
  0xcf   : > { %s3565_s23 = scalar_lea.hbm %s4063_s5, %s3395_s3  ;;  %s2929_s9 = scalar_lea.hbm %s4063_s5, 32 }
  0xd0   : > { %s2924_s21 = scalar_lea.hbm %s3565_s23, 16  ;;  %p2930_p4 = scmp.lt.u32.totalorder %s3565_s23, %s4063_s5 }
  0xd1   : > { %p2925_p13 = scmp.ne.s32.totalorder %s3565_s23, %s2924_s21  ;;  %p2931_p10 = scmp.lt.u32.totalorder %s2929_s9, %s2924_s21 }
  0xd2   : > { %p2933_p1 = scmp.lt.u32.totalorder %s2924_s21, %s3565_s23 }
  0xd3   : > { %p2927_p3 = pnand %p2925_p13, %p3422_p7  ;;  %p2932_p6 = por %p2931_p10, %p2930_p4 }
  0xd5   : > { %p2928_p0 = pneg %p2927_p3  ;;  %p2934_p2 = por %p2933_p1, %p2932_p6 }
  0xd7   : > { %p2935_p5 = pnand %p2934_p2, %p2928_p0 }
  0xd9   : > { %2938 = shalt.err (!%p2935_p5)
}
  0xda   : > { %s2939_s14 = scalar_lea.vmem %s554_s24, 16  ;;  %s3189_s28 = smov [#allocation8]  }
  0xdb   : > { %p2940_p9 = scmp.ne.s32.totalorder %s554_s24, %s2939_s14  ;;  %s2944_s6 = sshll.u32 %s3189_s28, 4  ;;  %s2945_s6 = int_to_ptr.vmem [resolvable:$false] %s2944_s6 }
  0xdc   : > { %s2946_s17 = scalar_lea.vmem %s2945_s6, 32  ;;  %p2947_p13 = scmp.lt.s32.totalorder %s554_s24, %s2945_s6 }
  0xdd   : > { %p2942_p11 = pnand %p2940_p9, %p3422_p7  ;;  %p2948_p3 = scmp.lt.s32.totalorder %s2946_s17, %s2939_s14 }
  0xdf   : > { %p2943_p8 = pneg %p2942_p11  ;;  %p2949_p12 = por %p2948_p3, %p2947_p13 }
  0xe1   : > { %p2950_p4 = pnand %p2949_p12, %p2943_p8 }
  0xe3   : > { %2953 = shalt.err (!%p2950_p4)
}
  0xe4   : > { %p4064_p10 = scmp.ne.s32.totalorder %s4045_s1, 0  ;;  %s4065_s21 = scalar_lea.sflag [#allocation7], %s3404_s27 }
  0xe5   : > { %s2386_s30 = sshll.u32 %s3174_s26, 8  ;;  %s4066_s7 = sld [smem:[#allocation44_spill]] }
  0xe6   : > { %2567 = dma.hbm_to_vmem [thread:$0]  (!%p4064_p10), %s3565_s23, 16, %s554_s24, %s4065_s21  }
  0xe7   : > { %s581_s14 = scalar_lea.vmem [#allocation11], %s2326_s4 }
  0xe8   : > { %s588_s28 = sshll.u32 %s581_s14, 4  ;;  %s3596_s28 = int_to_ptr.vmem [resolvable:$true] %s588_s28 }
  0xeb   : > { %s3592_s13 = scalar_lea.hbm %s4066_s7, %s2386_s30  ;;  %s2959_s17 = scalar_lea.hbm %s4066_s7, 512 }
  0xec   : > { %s2954_s6 = scalar_lea.hbm %s3592_s13, 256  ;;  %p2960_p1 = scmp.lt.u32.totalorder %s3592_s13, %s4066_s7 }
  0xed   : > { %p2955_p12 = scmp.ne.s32.totalorder %s3592_s13, %s2954_s6  ;;  %p2961_p2 = scmp.lt.u32.totalorder %s2959_s17, %s2954_s6 }
  0xee   : > { %p2963_p9 = scmp.lt.u32.totalorder %s2954_s6, %s3592_s13 }
  0xef   : > { %p2957_p0 = pnand %p2955_p12, %p3422_p7  ;;  %p2962_p5 = por %p2961_p2, %p2960_p1 }
  0xf1   : > { %p2958_p6 = pneg %p2957_p0  ;;  %p2964_p11 = por %p2963_p9, %p2962_p5 }
  0xf3   : > { %p2965_p8 = pnand %p2964_p11, %p2958_p6 }
  0xf5   : > { %2968 = shalt.err (!%p2965_p8)
}
  0xf6   : > { %s2969_s4 = scalar_lea.vmem %s3596_s28, 256  ;;  %s3190_s9 = smov [#allocation11]  }
  0xf7   : > { %p2970_p13 = scmp.ne.s32.totalorder %s3596_s28, %s2969_s4  ;;  %s2974_s0 = sshll.u32 %s3190_s9, 4  ;;  %s2975_s0 = int_to_ptr.vmem [resolvable:$false] %s2974_s0 }
  0xf8   : > { %s2976_s14 = scalar_lea.vmem %s2975_s0, 512  ;;  %p2977_p12 = scmp.lt.s32.totalorder %s3596_s28, %s2975_s0 }
  0xf9   : > { %p2972_p3 = pnand %p2970_p13, %p3422_p7  ;;  %p2978_p0 = scmp.lt.s32.totalorder %s2976_s14, %s2969_s4 }
  0xfb   : > { %p2973_p4 = pneg %p2972_p3  ;;  %p2979_p1 = por %p2978_p0, %p2977_p12 }
  0xfd   : > { %p2980_p2 = pnand %p2979_p1, %p2973_p4 }
  0xff   : > { %2983 = shalt.err (!%p2980_p2)
}
 0x100   : > { %s3191_s6 = smov 64   ;;  %s3192_s23 = smov 4  }
 0x101   : > { %s4067_s24 = scalar_lea.sflag [#allocation10], %s3404_s27  ;;  %s4068_s10 = sld [smem:[#allocation47_spill]] }
 0x102   : > { %2573 = dma.hbm_to_vmem [thread:$0]  (!%p4064_p10), %s3592_s13, 256, %s3596_s28, %s4067_s24, %s3191_s6, %s3191_s6, %s3192_s23  }
 0x103   : > { %s626_s4 = scalar_lea.vmem [#allocation14], %s3388_s15 }
 0x104   : > { %s633_s9 = sshll.u32 %s626_s4, 4  ;;  %s634_s9 = int_to_ptr.vmem [resolvable:$true] %s633_s9 }
 0x107   : > { %s3625_s30 = scalar_lea.hbm %s4068_s10, %s3395_s3  ;;  %s2989_s13 = scalar_lea.hbm %s4068_s10, 32 }
 0x108   : > { %s2984_s0 = scalar_lea.hbm %s3625_s30, 16  ;;  %p2990_p11 = scmp.lt.u32.totalorder %s3625_s30, %s4068_s10 }
 0x109   : > { %p2985_p6 = scmp.ne.s32.totalorder %s3625_s30, %s2984_s0  ;;  %p2991_p8 = scmp.lt.u32.totalorder %s2989_s13, %s2984_s0 }
 0x10a   : > { %p2993_p3 = scmp.lt.u32.totalorder %s2984_s0, %s3625_s30 }
 0x10b   : > { %p2987_p5 = pnand %p2985_p6, %p3422_p7  ;;  %p2992_p13 = por %p2991_p8, %p2990_p11 }
 0x10d   : > { %p2988_p9 = pneg %p2987_p5  ;;  %p2994_p4 = por %p2993_p3, %p2992_p13 }
 0x10f   : > { %p2995_p12 = pnand %p2994_p4, %p2988_p9 }
 0x111   : > { %2998 = shalt.err (!%p2995_p12)
}
 0x112   : > { %s2999_s23 = scalar_lea.vmem %s634_s9, 16  ;;  %s3193_s24 = smov [#allocation14]  }
 0x113   : > { %p3000_p0 = scmp.ne.s32.totalorder %s634_s9, %s2999_s23  ;;  %s3004_s17 = sshll.u32 %s3193_s24, 4  ;;  %s3005_s17 = int_to_ptr.vmem [resolvable:$false] %s3004_s17 }
 0x114   : > { %s3006_s2 = scalar_lea.vmem %s3005_s17, 32  ;;  %p3007_p6 = scmp.lt.s32.totalorder %s634_s9, %s3005_s17 }
 0x115   : > { %p3002_p1 = pnand %p3000_p0, %p3422_p7  ;;  %p3008_p5 = scmp.lt.s32.totalorder %s3006_s2, %s2999_s23 }
 0x117   : > { %p3003_p2 = pneg %p3002_p1  ;;  %p3009_p10 = por %p3008_p5, %p3007_p6 }
 0x119   : > { %p3010_p8 = pnand %p3009_p10, %p3003_p2 }
 0x11b   : > { %3013 = shalt.err (!%p3010_p8)
}
 0x11c   : > { %p4069_p11 = scmp.ne.s32.totalorder %s4045_s1, 0  ;;  %s4070_s21 = scalar_lea.sflag [#allocation13], %s3404_s27 }
 0x11d   : > { %s3651_s14 = scalar_lea.hbm %s3990_s12, %s3395_s3  ;;  %s660_s13 = scalar_lea.vmem [#allocation17], %s3388_s15 }
 0x11e   : > { %2579 = dma.hbm_to_vmem [thread:$0]  (!%p4069_p11), %s3625_s30, 16, %s634_s9, %s4070_s21  }
 0x11f   : > { %s667_s28 = sshll.u32 %s660_s13, 4  ;;  %s3014_s6 = scalar_lea.hbm %s3651_s14, 16  ;;  %s668_s28 = int_to_ptr.vmem [resolvable:$true] %s667_s28 }
 0x120   : > { %p3015_p10 = scmp.ne.s32.totalorder %s3651_s14, %s3014_s6  ;;  %s3019_s30 = scalar_lea.hbm %s3990_s12, 32 }
 0x121   : > { %p3020_p3 = scmp.lt.u32.totalorder %s3651_s14, %s3990_s12  ;;  %p3021_p4 = scmp.lt.u32.totalorder %s3019_s30, %s3014_s6 }
 0x122   : > { %p3017_p9 = pnand %p3015_p10, %p3422_p7  ;;  %p3023_p0 = scmp.lt.u32.totalorder %s3014_s6, %s3651_s14 }
 0x123   : > { %p3022_p12 = por %p3021_p4, %p3020_p3 }
 0x124   : > { %p3018_p13 = pneg %p3017_p9 }
 0x125   : > { %p3024_p1 = por %p3023_p0, %p3022_p12 }
 0x127   : > { %p3025_p2 = pnand %p3024_p1, %p3018_p13 }
 0x129   : > { %3028 = shalt.err (!%p3025_p2)
}
 0x12a   : > { %s3029_s15 = scalar_lea.vmem %s668_s28, 16  ;;  %s3194_s3 = smov [#allocation17]  }
 0x12b   : > { %p3030_p6 = scmp.ne.s32.totalorder %s668_s28, %s3029_s15  ;;  %s3034_s2 = sshll.u32 %s3194_s3, 4  ;;  %s3035_s2 = int_to_ptr.vmem [resolvable:$false] %s3034_s2 }
 0x12c   : > { %s3036_s21 = scalar_lea.vmem %s3035_s2, 32  ;;  %p3037_p10 = scmp.lt.s32.totalorder %s668_s28, %s3035_s2 }
 0x12d   : > { %p3032_p5 = pnand %p3030_p6, %p3422_p7  ;;  %p3038_p9 = scmp.lt.s32.totalorder %s3036_s21, %s3029_s15 }
 0x12f   : > { %p3033_p8 = pneg %p3032_p5  ;;  %p3039_p11 = por %p3038_p9, %p3037_p10 }
 0x131   : > { %p3040_p3 = pnand %p3039_p11, %p3033_p8 }
 0x133   : > { %3043 = shalt.err (!%p3040_p3)
}
 0x134   : > { %p4071_p4 = scmp.ne.s32.totalorder %s4045_s1, 0  ;;  %s4072_s4 = scalar_lea.sflag [#allocation16], %s3404_s27 }
 0x135   : > { %p4073_p13 = scmp.ne.s32.totalorder %s4051_s20, 0 }
 0x136   : > { %2585 = dma.hbm_to_vmem [thread:$0]  (!%p4071_p4), %s3651_s14, 16, %s668_s28, %s4072_s4  }
 0x137   : > { %676 = sbr.rel (%p4073_p13) target bundleno = 3110 (0xc26), region = 80  ;;  %s3676_s18 = sand.u32 (!%p4073_p13), 1, %s3158_s22  }
 0x138   : > { %s679_s0 = scalar_lea.sflag (!%p4073_p13), [#allocation4], %s3676_s18  ;;  %p4074_p7 = scmp.ne.s32.totalorder (!%p4073_p13), %s4039_s16, 0 }
 0x13e   : > { %3117 = dma.done.wait (%p4074_p7), %s679_s0, 16  }
 0x13f   : > { %3119 = vsyncadd (%p4074_p7), %s679_s0, 4294967280  ;;  %s686_s27 = sand.u32 1, %s3342_s29  }
 0x140   : > { %s687_s1 = scalar_lea.sflag [#allocation7], %s686_s27 }
 0x141   : > { %3121 = dma.done.wait (%p4074_p7), %s687_s1, 32  }
 0x142   : > { %3123 = vsyncadd (%p4074_p7), %s687_s1, 4294967264  ;;  %s703_s28 = scalar_lea.sflag [#allocation10], %s686_s27 }
 0x143   : > { %3125 = dma.done.wait (%p4074_p7), %s703_s28, 272  }
 0x144   : > { %3127 = vsyncadd (%p4074_p7), %s703_s28, 4294967024  ;;  %s2334_s29 = sshll.u32 %s3676_s18, 4  ;;  %s720_s24 = scalar_lea.sflag [#allocation13], %s686_s27 }
 0x145   : > { %s3697_s23 = scalar_lea.vmem [#allocation11], %s2334_s29 }
 0x146   : > { %3129 = dma.done.wait (%p4074_p7), %s720_s24, 32  }
 0x147   : > { %3131 = vsyncadd (%p4074_p7), %s720_s24, 4294967264  ;;  %s736_s17 = scalar_lea.sflag [#allocation16], %s686_s27 }
 0x148   : > { %3133 = dma.done.wait (%p4074_p7), %s736_s17, 32  }
 0x149   : > { %3135 = vsyncadd (%p4074_p7), %s736_s17, 4294967264  ;;  %s4075_s3 = sld [smem:[#allocation28_spill]]  ;;  %s4013_s2 = sand.u32 1, %s3146_s19  }
 0x14a   : > { %s2335_s21 = sshll.u32 %s4013_s2, 4  ;;  %p845_p11 = scmp.lt.s32.totalorder %s3170_s25, 1 }
 0x14b   : > { %s4076_s29 = sld [smem:[#allocation37_spill]]  ;;  %s4077_s9 = sld [smem:[#allocation38_spill]] }
 0x14c   : > { %s846_s4 = scalar_select %p845_p11, %s3170_s25, 1 }
 0x14d   : > { %s4078_s20 = sld [smem:[#allocation40_spill]]  ;;  %s4079_s8 = sld [smem:[#allocation46_spill]] }
 0x14e   : > { %s2387_s27 = sshll.u32 %s846_s4, 4  ;;  %s746_s4 = scalar_lea.vmem [#allocation17], %s3676_s18 }
 0x14f   : > { %p850_p12 = scmp.lt.s32.totalorder %s4075_s3, 1  ;;  %s3734_s11 = scalar_lea.vmem [#allocation18], %s2335_s21 }
 0x150   : > { %p2344_p0 = scmp.ne.s32.totalorder %s4075_s3, 0 }
 0x151   : > { %s851_s0 = scalar_select %p850_p12, %s4075_s3, 1 }
 0x152   : > { %s849_s16 = scalar_lea.vmem %s4076_s29, %s2387_s27  ;;  %869 = sbr.rel (%p2344_p0) target bundleno = 345 (0x159), region = 120  ;;  %vm872_vm0 = vcmask (!%p2344_p0), 261120  }
 0x153   : > { %s2388_s24 = sshll.u32 %s851_s0, 4  ;;  %s2390_s2 = sshll.u32 %s851_s0, 5  ;;  %v870_v0 = vld [vmem:[%s849_s16] sm:$0xff] (!%p2344_p0)  ;;  %v871_v1 = vld [vmem:[%s849_s16 + $0x8] sm:$0xff] (!%p2344_p0) }
 0x154   : > { %s854_s30 = scalar_lea.vmem %s4077_s9, %s2388_s24  ;;  %s3726_s13 = scalar_lea.vmem %s4078_s20, %s2388_s24  ;;  %873 = vst.msk [vmem:[#allocation2] sm:$0xff] (!%p2344_p0), %vm872_vm0, %v870_v0  ;;  %874 = vst.msk [vmem:[#allocation2 + $0x8] sm:$0xff] (!%p2344_p0), %vm872_vm0, %v871_v1 }
 0x155   : > { %s3731_s10 = scalar_lea.vmem %s4079_s8, %s2390_s2 }
 0x159 PF: > { %v2724_v2 = vld [vmem:[%s854_s30] sm:$0xff]   ;;  %v3195_v3 = vmov 0.0   ;;  %v2725_v4 = vld [vmem:[%s854_s30 + $0x8] sm:$0xff]   ;;  %vm3196_vm1 = vmmov 0   ;;  %vm901_vm2 = vcmask 261120   ;;  %s4080_s5 = scalar_lea.vmem [#allocation3], %s3676_s18  ;;  %v996_v53 = vlaneseq }
 0x15a   : > { %2430 = vmatprep.subr.bf16.mxu1 %v3195_v3  ;;  %2444 = vmatprep.subr.bf16.mxu0 %v3195_v3  ;;  %v2345_v8 = vld [vmem:[%s4080_s5] ss:$0 sm:$0xff]  ;;  %s3197_s7 = smov 104   ;;  %s3198_s8 = smov 120   ;;  %vm1011_vm3 = vcmask 64512   ;;  %vm1209_vm9 = vcmask 130048  }
 0x15b   : > { %2431 = vmatpush3.bf16.msra.mxu1 %v2724_v2  ;;  %2434 = vmatprep.mubr.msk.bf16.mxu1 %vm3196_vm1, %v3195_v3  ;;  %v3741_v5 = vld [vmem:[#allocation2] sm:$0xff]  ;;  %v3743_v6 = vld [vmem:[#allocation2 + $0x8] sm:$0xff]  ;;  %s3199_s20 = smov 112   ;;  %s3200_s14 = smov 96   ;;  %v997_v54 = vshrl.u32 %v996_v53, 7  ;;  %v1000_v55 = vand.u32 127, %v996_v53 }
 0x15c   : > { %2432 = vmatprep.subr.bf16.mxu1 %v3195_v3  ;;  %2446 = vmatprep.mubr.msk.bf16.mxu0 %vm3196_vm1, %v3195_v3  ;;  %v877_v7 = vpack.c.bf16 %v3743_v6, %v3741_v5  ;;  %v3201_v57 = vmov -1e+30   ;;  %s3202_s6 = smov 64   ;;  %vm1499_vm10 = vcmask 1043456   ;;  %s4083_s30 = scalar_lea.vmem [#allocation9], %s3676_s18  ;;  %vm1857_vm11 = vcmask 523264  }
 0x15d   : > { %v998_v56 = vadd.s32 8, %v997_v54  ;;  %vm1001_vm4 = vcmp.le.s32.totalorder %v1000_v55, %v997_v54  ;;  %vm1003_vm5 = vcmp.lt.s32.totalorder %v1000_v55, 9  ;;  %s4084_s9 = scalar_lea.vmem [#allocation12], %s3676_s18  ;;  %s4085_s15 = scalar_lea.vmem [#allocation14], %s3676_s18 }
 0x15e   : > { %vm1004_vm7 = vmand %vm1001_vm4, %vm1003_vm5  ;;  %s4087_s3 = sld [smem:[#allocation28_spill]] }
 0x15f   : > { %2433 = vmatpush3.bf16.msra.mxu1 %v2725_v4  ;;  %vm1002_vm6 = vcmp.le.s32.totalorder %v1000_v55, %v998_v56  ;;  %v1006_v58 = vsel %vm1004_vm7, 0.0, %v3201_v57 }
 0x160   : > { %2438 = vmatprep.subr.bf16.mxu1 %v3195_v3  ;;  %vm1005_vm8 = vmand %vm1002_vm6, %vm1003_vm5 }
 0x161   : > { %v1007_v60 = vsel %vm1005_vm8, 0.0, %v3201_v57 }
 0x162   : > { %2435 = vmatmul.mubr.msk.bf16.vlgmr.msra.gmra.mrb[0].mxu1 %vm901_vm2, %v877_v7 }
 0x163   : > { %2440 = vmatprep.mubr.msk.bf16.mxu1 %vm3196_vm1, %v3195_v3 }
 0x164   : > { %p2376_p1 = scmp.ne.s32.totalorder %s4087_s3, 1 }
 0x165   : > { %s4088_s0 = sld [smem:[#allocation49_spill]] (!%p2376_p1)  ;;  %vm3204_vm12 = vmmov (!%p2376_p1), 0   ;;  %s4089_s29 = sld [smem:[#allocation50_spill]] (!%p2376_p1) }
 0x235   : > { %v939_v9 = vpop.f32.mrb[0].mxu1 }
 0x236   : > { %v2436_v10 = vpop.f32.mrb[1].mxu1  ;;  %v940_v11 = vadd.f32 %v2345_v8, %v939_v9 }
 0x237   : > { %v942_v12 = vpop.f32.mrb[2].mxu1 }
 0x238   : > { %v943_v13 = vadd.f32 %v2345_v8, %v942_v12  ;;  %v2437_v14 = vpop.f32.mrb[3].mxu1  ;;  %v946_v17 = vmul.f32 0.35355338, %v940_v11 }
 0x23a   : > { %v2704_v15 = vpack.i.bf16 %v943_v13, %v940_v11  ;;  %v3756_v16 = vpack.c.bf16 %v943_v13, %v940_v11  ;;  %v947_v18 = vmul.f32 0.35355338, %v943_v13 }
 0x23c   : > { %2705 = vrot.lane.b32.xlu1 %v2704_v15, %s3197_s7  ;;  %2695 = vrot.lane.b32.xlu0 %v2704_v15, %s3198_s8  ;;  %v2709_v19 = vpack.i.bf16 %v947_v18, %v946_v17  ;;  %v968_v20 = vpack.c.bf16 %v947_v18, %v946_v17 }
 0x240   : > { %2700 = vrot.lane.b32.xlu0 %v2704_v15, %s3199_s20  ;;  %1009 = vrot.lane.b32.xlu1 %v3756_v16, %s3200_s14 }
 0x244   : > { %2710 = vrot.lane.b32.xlu1 %v2709_v19, %s3198_s8 }
 0x2ae   : > { %v2706_v21 = vpop.permute.xlu1 %2705  ;;  %v2696_v22 = vpop.permute.xlu0 %2695 }
 0x2af   : > { %v2708_v23 = vunpack.i.h.bf16 %v2706_v21  ;;  %v2707_v24 = vunpack.i.l.bf16 %v2706_v21  ;;  %v2698_v25 = vunpack.i.h.bf16 %v2696_v22  ;;  %v2697_v26 = vunpack.i.l.bf16 %v2696_v22 }
 0x2b1   : > { %v3760_v27 = vpack.c.bf16 %v2708_v23, %v2707_v24  ;;  %v3762_v28 = vpack.c.bf16 %v2698_v25, %v2697_v26 }
 0x2b2   : > { %v2701_v29 = vpop.permute.xlu0 %2700  ;;  %v1010_v30 = vpop.permute.xlu1 %1009 }
 0x2b3   : > { %v2703_v31 = vunpack.i.h.bf16 %v2701_v29  ;;  %v2702_v32 = vunpack.i.l.bf16 %v2701_v29  ;;  %v1016_v33 = vsel %vm1011_vm3, %v1010_v30, 0  ;;  %1060 = vrot.lane.b32.xlu0 %v3762_v28, %s3200_s14  ;;  %1160 = vrot.lane.b32.xlu1 %v3760_v27, %s3200_s14 }
 0x2b4   : > { %2439 = vmatpush3.bf16.xpose.msra.mxu1 %v1016_v33 }
 0x2b5   : > { %v3767_v34 = vpack.c.bf16 %v2703_v31, %v2702_v32  ;;  %2450 = vmatprep.subr.bf16.mxu1 %v3195_v3 }
 0x2b6   : > { %v2711_v35 = vpop.permute.xlu1 %2710 }
 0x2b7   : > { %1110 = vrot.lane.b32.xlu0 %v3767_v34, %s3200_s14  ;;  %2720 = vrot.lane.b32.xlu1 %v2709_v19, %s3197_s7  ;;  %v2713_v39 = vunpack.i.h.bf16 %v2711_v35  ;;  %v2712_v40 = vunpack.i.l.bf16 %v2711_v35 }
 0x2b9   : > { %v969_v43 = vpack.c.bf16 %v2713_v39, %v2712_v40 }
 0x2bb   : > { %2715 = vrot.lane.b32.xlu0 %v2709_v19, %s3199_s20  ;;  %2441 = vmatmul.mubr.msk.bf16.vlgmr.msra.gmra.mrb[4].mxu1 %vm1011_vm3, %v968_v20 }
 0x2bc   : > { %2452 = vmatprep.mubr.msk.bf16.mxu1 %vm3196_vm1, %v3195_v3 }
 0x325   : > { %v1061_v36 = vpop.permute.xlu0 %1060  ;;  %v1161_v38 = vpop.permute.xlu1 %1160 }
 0x326   : > { %v1066_v37 = vsel %vm1011_vm3, %v1061_v36, 0  ;;  %v1166_v46 = vsel %vm1011_vm3, %v1161_v38, 0 }
 0x327   : > { %2445 = vmatpush3.bf16.xpose.msra.mxu0 %v1066_v37 }
 0x328   : > { %2456 = vmatprep.subr.bf16.mxu0 %v3195_v3 }
 0x329   : > { %v1111_v41 = vpop.permute.xlu0 %1110  ;;  %v2721_v44 = vpop.permute.xlu1 %2720 }
 0x32a   : > { %v1116_v42 = vsel %vm1011_vm3, %v1111_v41, 0  ;;  %v2723_v49 = vunpack.i.h.bf16 %v2721_v44  ;;  %v2722_v50 = vunpack.i.l.bf16 %v2721_v44 }
 0x32b   : > { %2451 = vmatpush3.bf16.xpose.msra.mxu1 %v1116_v42 }
 0x32c   : > { %2462 = vmatprep.subr.bf16.mxu1 %v3195_v3  ;;  %v971_v52 = vpack.c.bf16 %v2723_v49, %v2722_v50 }
 0x32d   : > { %v2716_v45 = vpop.permute.xlu0 %2715 }
 0x32e   : > { %v2718_v47 = vunpack.i.h.bf16 %v2716_v45  ;;  %v2717_v48 = vunpack.i.l.bf16 %v2716_v45  ;;  %2447 = vmatmul.mubr.msk.bf16.vlgmr.msra.gmra.mrb[0].mxu0 %vm1011_vm3, %v969_v43 }
 0x32f   : > { %2457 = vmatpush3.bf16.xpose.msra.mxu0 %v1166_v46  ;;  %2458 = vmatprep.mubr.msk.bf16.mxu0 %vm3196_vm1, %v3195_v3 }
 0x330   : > { %v970_v51 = vpack.c.bf16 %v2718_v47, %v2717_v48  ;;  %2468 = vmatprep.subr.bf16.mxu0 %v3195_v3 }
 0x332   : > { %2453 = vmatmul.mubr.msk.bf16.vlgmr.msra.gmra.mrb[8].mxu1 %vm1011_vm3, %v970_v51 }
 0x333   : > { %2464 = vmatprep.mubr.msk.bf16.mxu1 %vm3196_vm1, %v3195_v3 }
 0x336   : > { %2459 = vmatmul.mubr.msk.bf16.vlgmr.msra.gmra.mrb[4].mxu0 %vm1011_vm3, %v971_v52 }
 0x337   : > { %2470 = vmatprep.mubr.msk.bf16.mxu0 %vm3196_vm1, %v3195_v3 }
 0x38e   : > { %v1052_v59 = vpop.f32.mrb[4].mxu1 }
 0x38f   : > { %v1053_v61 = vadd.f32 %v1052_v59, %v1006_v58  ;;  %v2442_v62 = vpop.f32.mrb[5].mxu1 }
 0x390   : > { %v1055_v63 = vpop.f32.mrb[6].mxu1 }
 0x391   : > { %v1056_v0 = vadd.f32 %v1055_v63, %v1007_v60  ;;  %v2443_v1 = vpop.f32.mrb[7].mxu1  ;;  %v1210_v2 = vsel %vm1209_vm9, %v1053_v61, -inf }
 0x392   : > { %1211 = vmax.xlane.f32.xlu0 %v1210_v2 }
 0x393   : > { %v1213_v4 = vsel %vm1209_vm9, %v1056_v0, -inf }
 0x394   : > { %1214 = vmax.xlane.f32.xlu1 %v1213_v4 }
 0x401   : > { %v1102_v7 = vpop.f32.mrb[0].mxu0 }
 0x402   : > { %v1103_v8 = vadd.f32 %v1102_v7, %v1006_v58  ;;  %v2448_v9 = vpop.f32.mrb[1].mxu0 }
 0x403   : > { %v1105_v10 = vpop.f32.mrb[2].mxu0 }
 0x404   : > { %v1106_v11 = vadd.f32 %v1105_v10, %v1007_v60  ;;  %v2449_v12 = vpop.f32.mrb[3].mxu0  ;;  %v1216_v13 = vsel %vm1209_vm9, %v1103_v8, -inf }
 0x405   : > { %1217 = vmax.xlane.f32.xlu0 %v1216_v13  ;;  %v1152_v14 = vpop.f32.mrb[8].mxu1 }
 0x406   : > { %v1153_v15 = vadd.f32 %v1152_v14, %v1006_v58  ;;  %v2454_v17 = vpop.f32.mrb[9].mxu1  ;;  %v1219_v21 = vsel %vm1209_vm9, %v1106_v11, -inf }
 0x407   : > { %v1155_v18 = vpop.f32.mrb[10].mxu1 }
 0x408   : > { %v1156_v19 = vadd.f32 %v1155_v18, %v1007_v60  ;;  %v2455_v20 = vpop.f32.mrb[11].mxu1  ;;  %v1222_v22 = vsel %vm1209_vm9, %v1153_v15, -inf }
 0x409   : > { %v1202_v23 = vpop.f32.mrb[4].mxu0  ;;  %1220 = vmax.xlane.f32.xlu0 %v1219_v21  ;;  %1223 = vmax.xlane.f32.xlu1 %v1222_v22 }
 0x40a   : > { %v1203_v24 = vadd.f32 %v1202_v23, %v1006_v58  ;;  %v2460_v25 = vpop.f32.mrb[5].mxu0  ;;  %v1225_v32 = vsel %vm1209_vm9, %v1156_v19, -inf }
 0x40b   : > { %v1205_v26 = vpop.f32.mrb[6].mxu0 }
 0x40c   : > { %v1206_v29 = vadd.f32 %v1205_v26, %v1007_v60  ;;  %v2461_v30 = vpop.f32.mrb[7].mxu0  ;;  %v1228_v31 = vsel %vm1209_vm9, %v1203_v24, -inf }
 0x40d   : > { %1229 = vmax.xlane.f32.xlu1 %v1228_v31  ;;  %1226 = vmax.xlane.f32.xlu0 %v1225_v32 }
 0x40e   : > { %v1231_v33 = vsel %vm1209_vm9, %v1206_v29, -inf }
 0x411   : > { %1232 = vmax.xlane.f32.xlu0 %v1231_v33 }
 0x41e   : > { %1302 = vrot.lane.b32.xlu1 %v3756_v16, %s3202_s6 }
 0x41f   : > { %v1212_v38 = vpop.xlane.xlu0 %1211 }
 0x420   : > { %v1234_v39 = vsub.f32 %v1053_v61, %v1212_v38 }
 0x421   : > { %v1215_v35 = vpop.xlane.xlu1 %1214 }
 0x422   : > { %v1235_v36 = vsub.f32 %v1056_v0, %v1215_v35  ;;  %v1242_v41 = vmul.f32 1.442695, %v1234_v39 }
 0x424   : > { %v1244_v37 = vmul.f32 1.442695, %v1235_v36 }
 0x426   : > { %2732 = vpow2.f32 %v1244_v37 }
 0x427   : > { %2734 = vpow2.f32 %v1242_v41 }
 0x430   : > { %v2733_v40 = vpop.eup %2732 }
 0x431   : > { %v1261_v42 = vsel %vm1209_vm9, %v2733_v40, 0.0  ;;  %v2735_v43 = vpop.eup %2734 }
 0x432   : > { %1262 = vadd.xlane.f32.xlu0 %v1261_v42  ;;  %v1258_v44 = vsel %vm1209_vm9, %v2735_v43, 0.0 }
 0x442   : > { %1259 = vadd.xlane.f32.xlu1 %v1258_v44 }
 0x492   : > { %v1218_v45 = vpop.xlane.xlu0 %1217 }
 0x493   : > { %v1236_v46 = vsub.f32 %v1103_v8, %v1218_v45 }
 0x495   : > { %v1246_v47 = vmul.f32 1.442695, %v1236_v46 }
 0x496   : > { %v1221_v16 = vpop.xlane.xlu0 %1220  ;;  %v1224_v48 = vpop.xlane.xlu1 %1223 }
 0x497   : > { %2736 = vpow2.f32 %v1246_v47  ;;  %v1237_v49 = vsub.f32 %v1106_v11, %v1221_v16  ;;  %v1238_v50 = vsub.f32 %v1153_v15, %v1224_v48  ;;  %v1491_v16 = vld [vmem:[%s3726_s13 + $0x4] sm:$0xf] }
 0x498   : > { %v1501_v48 = vsel %vm1499_vm10, %v1491_v16, 0 }
 0x499   : > { %v1248_v51 = vmul.f32 1.442695, %v1237_v49  ;;  %v1250_v52 = vmul.f32 1.442695, %v1238_v50  ;;  %v1493_v50 = vld [vmem:[%s3726_s13 + $0xc] sm:$0xf] }
 0x49a   : > { %v1230_v53 = vpop.xlane.xlu1 %1229  ;;  %v1227_v54 = vpop.xlane.xlu0 %1226 }
 0x49b   : > { %2738 = vpow2.f32 %v1248_v51  ;;  %v1240_v55 = vsub.f32 %v1203_v24, %v1230_v53  ;;  %v1239_v56 = vsub.f32 %v1156_v19, %v1227_v54 }
 0x49c   : > { %2740 = vpow2.f32 %v1250_v52 }
 0x49d   : > { %v1254_v57 = vmul.f32 1.442695, %v1240_v55  ;;  %v1252_v58 = vmul.f32 1.442695, %v1239_v56  ;;  %v1646_v55 = vsel %vm1499_vm10, %v1493_v50, 0  ;;  %v2727_v50 = vld [vmem:[%s3697_s23 + $0x8] sm:$0xff]  }
 0x49e   : > { %v1303_v59 = vpop.permute.xlu1 %1302  ;;  %v1233_v60 = vpop.xlane.xlu0 %1232 }
 0x49f   : > { %2742 = vpow2.f32 %v1254_v57  ;;  %v1241_v61 = vsub.f32 %v1206_v29, %v1233_v60  ;;  %2463 = vmatpush3.bf16.msra.mxu1 %v1303_v59  ;;  %v1492_v57 = vld [vmem:[%s3726_s13 + $0x8] sm:$0xf] }
 0x4a0   : > { %2744 = vpow2.f32 %v1252_v58  ;;  %2474 = vmatprep.subr.bf16.mxu1 %v3195_v3 }
 0x4a1   : > { %v2737_v62 = vpop.eup %2736  ;;  %v1256_v63 = vmul.f32 1.442695, %v1241_v61 }
 0x4a2   : > { %v1264_v0 = vsel %vm1209_vm9, %v2737_v62, 0.0 }
 0x4a3   : > { %2746 = vpow2.f32 %v1256_v63  ;;  %1265 = vadd.xlane.f32.xlu1 %v1264_v0 }
 0x4a5   : > { %v2739_v1 = vpop.eup %2738 }
 0x4a6   : > { %v2741_v2 = vpop.eup %2740  ;;  %v1267_v4 = vsel %vm1209_vm9, %v2739_v1, 0.0 }
 0x4a7   : > { %v1270_v7 = vsel %vm1209_vm9, %v2741_v2, 0.0  ;;  %1268 = vadd.xlane.f32.xlu0 %v1267_v4 }
 0x4a8   : > { %1271 = vadd.xlane.f32.xlu1 %v1270_v7 }
 0x4a9   : > { %v2743_v8 = vpop.eup %2742 }
 0x4aa   : > { %v2745_v9 = vpop.eup %2744  ;;  %v1276_v10 = vsel %vm1209_vm9, %v2743_v8, 0.0 }
 0x4ab   : > { %v1273_v11 = vsel %vm1209_vm9, %v2745_v9, 0.0 }
 0x4ac   : > { %1277 = vadd.xlane.f32.xlu1 %v1276_v10  ;;  %1274 = vadd.xlane.f32.xlu0 %v1273_v11 }
 0x4ad   : > { %v2747_v12 = vpop.eup %2746 }
 0x4ae   : > { %v1279_v13 = vsel %vm1209_vm9, %v2747_v12, 0.0 }
 0x4b0   : > { %1280 = vadd.xlane.f32.xlu0 %v1279_v13 }
 0x4bd   : > { %1396 = vrot.lane.b32.xlu1 %v3767_v34, %s3202_s6 }
 0x4bf   : > { %v1263_v14 = vpop.xlane.xlu0 %1262 }
 0x4c0   : > { %2748 = vrcp.f32 %v1263_v14 }
 0x4c1   : > { %1443 = vrot.lane.b32.xlu1 %v3760_v27, %s3202_s6 }
 0x4c6   : > { %1349 = vrot.lane.b32.xlu0 %v3762_v28, %s3202_s6 }
 0x4ca   : > { %v2749_v17 = vpop.eup %2748 }
 0x4cb   : > { %v1291_v19 = vmul.f32 %v2749_v17, %v2733_v40 }
 0x4cf   : > { %v1260_v15 = vpop.xlane.xlu1 %1259 }
 0x4d0   : > { %2750 = vrcp.f32 %v1260_v15 }
 0x4da   : > { %v2751_v18 = vpop.eup %2750 }
 0x4db   : > { %v1290_v20 = vmul.f32 %v2751_v18, %v2735_v43  ;;  %v1490_v43 = vld [vmem:[%s3726_s13] sm:$0xf]  ;;  %s4081_s13 = scalar_lea.vmem [#allocation6], %s3676_s18 }
 0x4dc   : > { %v1548_v47 = vsel %vm1499_vm10, %v1490_v43, 0 }
 0x4dd   : > { %v1298_v21 = vpack.c.bf16 %v1291_v19, %v1290_v20 }
 0x4df   : > { %2465 = vmatmul.mubr.msk.bf16.vlgmr.msra.gmra.mrb[12].mxu1 %vm1209_vm9, %v1298_v21 }
 0x4e0   : > { %2476 = vmatprep.mubr.msk.bf16.mxu1 %vm3196_vm1, %v3195_v3 }
 0x530   : > { %v1266_v34 = vpop.xlane.xlu1 %1265 }
 0x531   : > { %2752 = vrcp.f32 %v1266_v34 }
 0x534   : > { %v1269_v27 = vpop.xlane.xlu0 %1268 }
 0x535   : > { %v1272_v22 = vpop.xlane.xlu1 %1271  ;;  %2754 = vrcp.f32 %v1269_v27 }
 0x536   : > { %2756 = vrcp.f32 %v1272_v22 }
 0x539   : > { %v1278_v28 = vpop.xlane.xlu1 %1277  ;;  %v1275_v23 = vpop.xlane.xlu0 %1274 }
 0x53a   : > { %2758 = vrcp.f32 %v1275_v23 }
 0x53b   : > { %2760 = vrcp.f32 %v1278_v28  ;;  %v2753_v24 = vpop.eup %2752 }
 0x53c   : > { %v1292_v30 = vmul.f32 %v2753_v24, %v2737_v62  ;;  %v1596_v62 = vsel %vm1499_vm10, %v1492_v57, 0 }
 0x53d   : > { %v1397_v25 = vpop.permute.xlu1 %1396  ;;  %v1281_v26 = vpop.xlane.xlu0 %1280 }
 0x53e   : > { %2762 = vrcp.f32 %v1281_v26  ;;  %2475 = vmatpush3.bf16.msra.mxu1 %v1397_v25  ;;  %v2361_v25 = vld [vmem:[%s4081_s13] ss:$0 sm:$0xff] }
 0x53f   : > { %v2755_v29 = vpop.eup %2754  ;;  %2486 = vmatprep.subr.bf16.mxu1 %v3195_v3 }
 0x540   : > { %v1293_v31 = vmul.f32 %v2755_v29, %v2739_v1  ;;  %v2757_v35 = vpop.eup %2756 }
 0x541   : > { %v1350_v32 = vpop.permute.xlu0 %1349  ;;  %v1444_v37 = vpop.permute.xlu1 %1443  ;;  %v1294_v39 = vmul.f32 %v2757_v35, %v2741_v2 }
 0x542   : > { %2469 = vmatpush3.bf16.msra.mxu0 %v1350_v32  ;;  %v1299_v33 = vpack.c.bf16 %v1293_v31, %v1292_v30 }
 0x543   : > { %2480 = vmatprep.subr.bf16.mxu0 %v3195_v3 }
 0x544   : > { %v2759_v36 = vpop.eup %2758 }
 0x545   : > { %2471 = vmatmul.mubr.msk.bf16.vlgmr.msra.gmra.mrb[8].mxu0 %vm1209_vm9, %v1299_v33  ;;  %v2761_v38 = vpop.eup %2760  ;;  %v1295_v40 = vmul.f32 %v2759_v36, %v2745_v9 }
 0x546   : > { %2481 = vmatpush3.bf16.msra.mxu0 %v1444_v37  ;;  %2482 = vmatprep.mubr.msk.bf16.mxu0 %vm3196_vm1, %v3195_v3  ;;  %v1296_v44 = vmul.f32 %v2761_v38, %v2743_v8 }
 0x547   : > { %2492 = vmatprep.subr.bf16.mxu0 %v3195_v3  ;;  %v1300_v42 = vpack.c.bf16 %v1295_v40, %v1294_v39 }
 0x548   : > { %v2763_v41 = vpop.eup %2762 }
 0x549   : > { %v1297_v45 = vmul.f32 %v2763_v41, %v2747_v12  ;;  %2477 = vmatmul.mubr.msk.bf16.vlgmr.msra.gmra.mrb[16].mxu1 %vm1209_vm9, %v1300_v42 }
 0x54a   : > { %2488 = vmatprep.mubr.msk.bf16.mxu1 %vm3196_vm1, %v3195_v3  ;;  %2487 = vmatpush3.bf16.msra.mxu1 %v1501_v48 }
 0x54b   : > { %v1301_v46 = vpack.c.bf16 %v1297_v45, %v1296_v44  ;;  %2498 = vmatprep.subr.bf16.mxu1 %v3195_v3 }
 0x54d   : > { %2483 = vmatmul.mubr.msk.bf16.vlgmr.msra.gmra.mrb[12].mxu0 %vm1209_vm9, %v1301_v46 }
 0x54e   : > { %2493 = vmatpush3.bf16.msra.mxu0 %v1548_v47  ;;  %2494 = vmatprep.mubr.msk.bf16.mxu0 %vm3196_vm1, %v3195_v3 }
 0x54f   : > { %2504 = vmatprep.subr.bf16.mxu0 %v3195_v3 }
 0x5b2   : > { %v1342_v49 = vpop.f32.mrb[12].mxu1 }
 0x5b3   : > { %v2466_v51 = vpop.f32.mrb[13].mxu1 }
 0x5b4   : > { %v1345_v52 = vpop.f32.mrb[14].mxu1  ;;  %v2728_v51 = vld [vmem:[%s3731_s10] sm:$0xff]  }
 0x5b5   : > { %v1494_v53 = vpack.c.bf16 %v1345_v52, %v1342_v49  ;;  %v2467_v54 = vpop.f32.mrb[15].mxu1  ;;  %v2726_v49 = vld [vmem:[%s3697_s23] sm:$0xff]   ;;  %s4082_s23 = scalar_lea.vmem [#allocation8], %s3676_s18 }
 0x5b6   : > { %v2729_v52 = vld [vmem:[%s3731_s10 + $0x8] sm:$0xff]  }
 0x5b7   : > { %2495 = vmatmul.mubr.msk.bf16.vlgmr.msra.gmra.mrb[16].mxu0 %vm1011_vm3, %v1494_v53 }
 0x5b8   : > { %2505 = vmatpush3.bf16.msra.mxu0 %v1646_v55  ;;  %2506 = vmatprep.mubr.msk.bf16.mxu0 %vm3196_vm1, %v3195_v3 }
 0x5b9   : > { %2518 = vmatprep.subr.bf16.mxu0 %v3195_v3 }
 0x618   : > { %v1389_v56 = vpop.f32.mrb[8].mxu0 }
 0x619   : > { %v2472_v58 = vpop.f32.mrb[9].mxu0 }
 0x61a   : > { %v1392_v59 = vpop.f32.mrb[10].mxu0 }
 0x61b   : > { %v1495_v60 = vpack.c.bf16 %v1392_v59, %v1389_v56  ;;  %v2473_v61 = vpop.f32.mrb[11].mxu0 }
 0x61c   : > { %v1436_v63 = vpop.f32.mrb[16].mxu1  ;;  %v2362_v61 = vld [vmem:[%s4082_s23] ss:$0 sm:$0xff] }
 0x61d   : > { %2489 = vmatmul.mubr.msk.bf16.vlgmr.msra.gmra.mrb[20].mxu1 %vm1011_vm3, %v1495_v60  ;;  %v2478_v0 = vpop.f32.mrb[17].mxu1 }
 0x61e   : > { %2499 = vmatpush3.bf16.msra.mxu1 %v1596_v62  ;;  %2500 = vmatprep.mubr.msk.bf16.mxu1 %vm3196_vm1, %v3195_v3  ;;  %v1439_v1 = vpop.f32.mrb[18].mxu1 }
 0x61f   : > { %2510 = vmatprep.subr.bf16.mxu1 %v3195_v3  ;;  %v1591_v2 = vpack.c.bf16 %v1439_v1, %v1436_v63  ;;  %v2479_v4 = vpop.f32.mrb[19].mxu1  ;;  %v2363_v1 = vld [vmem:[%s4083_s30] ss:$0 sm:$0xff] }
 0x620   : > { %v1483_v7 = vpop.f32.mrb[12].mxu0 }
 0x621   : > { %v2484_v8 = vpop.f32.mrb[13].mxu0 }
 0x622   : > { %v1486_v9 = vpop.f32.mrb[14].mxu0 }
 0x623   : > { %v1641_v10 = vpack.c.bf16 %v1486_v9, %v1483_v7  ;;  %v2485_v11 = vpop.f32.mrb[15].mxu0  ;;  %v2730_v9 = vld [vmem:[%s3731_s10 + $0x10] sm:$0xff]  }
 0x624   : > { %v2364_v11 = vld [vmem:[%s4084_s9] ss:$0 sm:$0xff] }
 0x625   : > { %2501 = vmatmul.mubr.msk.bf16.vlgmr.msra.gmra.mrb[24].mxu1 %vm1011_vm3, %v1591_v2  ;;  %2507 = vmatmul.mubr.msk.bf16.vlgmr.msra.gmra.mrb[20].mxu0 %vm1011_vm3, %v1641_v10  ;;  %v2731_v10 = vld [vmem:[%s3731_s10 + $0x18] sm:$0xff]   ;;  %s4086_s10 = scalar_lea.vmem [#allocation15], %s3676_s18 }
 0x626   : > { %2514 = vmatprep.mubr.msk.bf16.mxu1 %vm3196_vm1, %v3195_v3  ;;  %2526 = vmatprep.mubr.msk.bf16.mxu0 %vm3196_vm1, %v3195_v3 }
 0x627   : > { %2511 = vmatpush3.bf16.msra.mxu1 %v2726_v49  ;;  %2519 = vmatpush3.bf16.msra.mxu0 %v2728_v51  ;;  %v2375_v49 = vld [vmem:[%s746_s4] ss:$0 sm:$0xff] }
 0x628   : > { %2512 = vmatprep.subr.bf16.mxu1 %v3195_v3  ;;  %2520 = vmatprep.subr.bf16.mxu0 %v3195_v3 }
 0x62b   : > { %2513 = vmatpush3.bf16.msra.mxu1 %v2727_v50  ;;  %2521 = vmatpush3.bf16.msra.mxu0 %v2729_v52 }
 0x62c   : > { %2522 = vmatprep.subr.bf16.mxu0 %v3195_v3 }
 0x62f   : > { %2523 = vmatpush3.bf16.msra.mxu0 %v2730_v9 }
 0x630   : > { %2524 = vmatprep.subr.bf16.mxu0 %v3195_v3 }
 0x633   : > { %2525 = vmatpush3.bf16.msra.mxu0 %v2731_v10 }
 0x68a   : > { %v1584_v12 = vpop.f32.mrb[16].mxu0 }
 0x68b   : > { %v2496_v13 = vpop.f32.mrb[17].mxu0 }
 0x68c   : > { %v1587_v14 = vpop.f32.mrb[18].mxu0 }
 0x68d   : > { %v2497_v15 = vpop.f32.mrb[19].mxu0 }
 0x6f0   : > { %v1537_v17 = vpop.f32.mrb[20].mxu1 }
 0x6f1   : > { %v1585_v18 = vadd.f32 %v1584_v12, %v1537_v17  ;;  %v2490_v19 = vpop.f32.mrb[21].mxu1 }
 0x6f2   : > { %v1540_v20 = vpop.f32.mrb[22].mxu1 }
 0x6f3   : > { %v1588_v21 = vadd.f32 %v1587_v14, %v1540_v20  ;;  %v2491_v34 = vpop.f32.mrb[23].mxu1 }
 0x6f4   : > { %v2368_v34 = vld [vmem:[%s4085_s15] ss:$0 sm:$0xff] }
 0x6f8   : > { %v1632_v27 = vpop.f32.mrb[24].mxu1  ;;  %v1682_v22 = vpop.f32.mrb[20].mxu0 }
 0x6f9   : > { %v1639_v28 = vadd.f32 %v1632_v27, %v1585_v18  ;;  %v2502_v23 = vpop.f32.mrb[25].mxu1  ;;  %v2508_v24 = vpop.f32.mrb[21].mxu0 }
 0x6fa   : > { %v1635_v26 = vpop.f32.mrb[26].mxu1  ;;  %v1685_v29 = vpop.f32.mrb[22].mxu0 }
 0x6fb   : > { %v1689_v30 = vadd.f32 %v1682_v22, %v1639_v28  ;;  %v1640_v31 = vadd.f32 %v1635_v26, %v1588_v21  ;;  %v2503_v32 = vpop.f32.mrb[27].mxu1  ;;  %v2509_v33 = vpop.f32.mrb[23].mxu0 }
 0x6fd   : > { %v1698_v35 = vadd.f32 %v2361_v25, %v1689_v30  ;;  %v1690_v36 = vadd.f32 %v1685_v29, %v1640_v31 }
 0x6ff   : > { %v1699_v37 = vadd.f32 %v2361_v25, %v1690_v36  ;;  %v1700_v38 = vadd.f32 %v1698_v35, %v3741_v5 }
 0x701   : > { %v1704_v39 = vsel %vm901_vm2, %v1700_v38, 0.0  ;;  %v1701_v40 = vadd.f32 %v1699_v37, %v3743_v6 }
 0x702   : > { %1705 = vadd.xlane.f32.xlu0 %v1704_v39 }
 0x703   : > { %v1707_v41 = vsel %vm901_vm2, %v1701_v40, 0.0 }
 0x704   : > { %1708 = vadd.xlane.f32.xlu1 %v1707_v41 }
 0x78f   : > { %v1706_v42 = vpop.xlane.xlu0 %1705 }
 0x790   : > { %v1711_v43 = vmul.f32 0.03125, %v1706_v42 }
 0x791   : > { %v1709_v44 = vpop.xlane.xlu1 %1708 }
 0x792   : > { %v1713_v45 = vsub.f32 %v1700_v38, %v1711_v43  ;;  %v1712_v46 = vmul.f32 0.03125, %v1709_v44 }
 0x794   : > { %v1714_v47 = vsub.f32 %v1701_v40, %v1712_v46  ;;  %v1715_v16 = vmul.f32 %v1713_v45, %v1713_v45 }
 0x796   : > { %v1717_v5 = vsel %vm901_vm2, %v1715_v16, 0.0  ;;  %v1716_v48 = vmul.f32 %v1714_v47, %v1714_v47 }
 0x797   : > { %1718 = vadd.xlane.f32.xlu0 %v1717_v5  ;;  %v2374_v5 = vld [vmem:[%s4086_s10] ss:$0 sm:$0xff] }
 0x798   : > { %v1720_v6 = vsel %vm901_vm2, %v1716_v48, 0.0 }
 0x79b   : > { %1721 = vadd.xlane.f32.xlu0 %v1720_v6 }
 0x824   : > { %v1719_v53 = vpop.xlane.xlu0 %1718 }
 0x825   : > { %v1723_v54 = vmul.f32 0.03125, %v1719_v53 }
 0x827   : > { %v1725_v55 = vadd.f32 1e-05, %v1723_v54 }
 0x828   : > { %v1722_v56 = vpop.xlane.xlu0 %1721 }
 0x829   : > { %2764 = vrsqrt.f32 %v1725_v55  ;;  %v1724_v57 = vmul.f32 0.03125, %v1722_v56  ;;  %v2772_v55 = vld [vmem:[%s4088_s0] sm:$0xff] (!%p2376_p1)   ;;  %v3203_v56 = vmov (!%p2376_p1), 0.0  }
 0x82a   : > { %2530 = vmatprep.subr.bf16.mxu0 (!%p2376_p1), %v3203_v56 }
 0x82b   : > { %v1726_v58 = vadd.f32 1e-05, %v1724_v57  ;;  %v2773_v57 = vld [vmem:[%s4088_s0 + $0x8] sm:$0xff] (!%p2376_p1)  }
 0x82d   : > { %2766 = vrsqrt.f32 %v1726_v58 }
 0x833   : > { %v2765_v59 = vpop.eup %2764 }
 0x834   : > { %v1729_v60 = vmul.f32 %v2765_v59, %v1713_v45  ;;  %v2377_v59 = vld [vmem:[%s4089_s29] ss:$0 sm:$0xff] (!%p2376_p1) }
 0x836   : > { %v1737_v63 = vmul.f32 %v2362_v61, %v1729_v60 }
 0x837   : > { %v2767_v62 = vpop.eup %2766 }
 0x838   : > { %v1730_v0 = vmul.f32 %v2767_v62, %v1714_v47  ;;  %v1745_v4 = vadd.f32 %v2363_v1, %v1737_v63 }
 0x83a   : > { %v1738_v2 = vmul.f32 %v2362_v61, %v1730_v0 }
 0x83c   : > { %v1746_v7 = vadd.f32 %v2363_v1, %v1738_v2 }
 0x83e   : > { %v1747_v8 = vpack.c.bf16 %v1746_v7, %v1745_v4 }
 0x840   : > { %2515 = vmatmul.mubr.msk.bf16.vlgmr.msra.gmra.mrb[28].mxu1 %vm901_vm2, %v1747_v8 }
 0x913   : > { %v1808_v12 = vpop.f32.mrb[28].mxu1 }
 0x914   : > { %v1809_v13 = vadd.f32 %v2364_v11, %v1808_v12  ;;  %v2516_v14 = vpop.f32.mrb[29].mxu1 }
 0x915   : > { %v1811_v15 = vpop.f32.mrb[30].mxu1 }
 0x916   : > { %v1812_v17 = vadd.f32 %v2364_v11, %v1811_v15  ;;  %v2517_v18 = vpop.f32.mrb[31].mxu1  ;;  %v1815_v19 = vmax.f32 %v1809_v13, 0.0 }
 0x918   : > { %v1816_v20 = vmax.f32 %v1812_v17, 0.0 }
 0x91a   : > { %v1817_v21 = vpack.c.bf16 %v1816_v20, %v1815_v19 }
 0x91c   : > { %2527 = vmatmul.mubr.msk.bf16.vlgmr.msra.gmra.mrb[24].mxu0 %vm1857_vm11, %v1817_v21 }
 0x91d   : > { %2531 = vmatpush3.bf16.msra.mxu0 (!%p2376_p1), %v2772_v55  ;;  %2534 = vmatprep.mubr.msk.bf16.mxu0 (!%p2376_p1), %vm3204_vm12, %v3203_v56 }
 0x91e   : > { %2532 = vmatprep.subr.bf16.mxu0 (!%p2376_p1), %v3203_v56 }
 0x921   : > { %2533 = vmatpush3.bf16.msra.mxu0 (!%p2376_p1), %v2773_v57 }
 0x9ef   : > { %v1895_v27 = vpop.f32.mrb[24].mxu0 }
 0x9f0   : > { %v1896_v22 = vadd.f32 %v2368_v34, %v1895_v27  ;;  %v2528_v3 = vpop.f32.mrb[25].mxu0 }
 0x9f1   : > { %v1898_v28 = vpop.f32.mrb[26].mxu0 }
 0x9f2   : > { %v1899_v23 = vadd.f32 %v2368_v34, %v1898_v28  ;;  %v2529_v24 = vpop.f32.mrb[27].mxu0  ;;  %v1902_v25 = vadd.f32 %v1896_v22, %v1745_v4 }
 0x9f4   : > { %v1906_v26 = vsel %vm901_vm2, %v1902_v25, 0.0  ;;  %v1903_v29 = vadd.f32 %v1899_v23, %v1746_v7 }
 0x9f5   : > { %1907 = vadd.xlane.f32.xlu1 %v1906_v26 }
 0x9f6   : > { %v1909_v30 = vsel %vm901_vm2, %v1903_v29, 0.0 }
 0x9f7   : > { %1910 = vadd.xlane.f32.xlu0 %v1909_v30 }
 0xa82   : > { %v1908_v31 = vpop.xlane.xlu1 %1907 }
 0xa83   : > { %v1912_v32 = vmul.f32 0.03125, %v1908_v31 }
 0xa84   : > { %v1911_v33 = vpop.xlane.xlu0 %1910 }
 0xa85   : > { %v1914_v35 = vsub.f32 %v1902_v25, %v1912_v32  ;;  %v1913_v36 = vmul.f32 0.03125, %v1911_v33 }
 0xa87   : > { %v1915_v37 = vsub.f32 %v1903_v29, %v1913_v36  ;;  %v1916_v38 = vmul.f32 %v1914_v35, %v1914_v35 }
 0xa89   : > { %v1918_v39 = vsel %vm901_vm2, %v1916_v38, 0.0  ;;  %v1917_v40 = vmul.f32 %v1915_v37, %v1915_v37 }
 0xa8a   : > { %1919 = vadd.xlane.f32.xlu1 %v1918_v39 }
 0xa8b   : > { %v1921_v41 = vsel %vm901_vm2, %v1917_v40, 0.0 }
 0xa8c   : > { %1922 = vadd.xlane.f32.xlu0 %v1921_v41 }
 0xb17   : > { %v1920_v42 = vpop.xlane.xlu1 %1919 }
 0xb18   : > { %v1924_v43 = vmul.f32 0.03125, %v1920_v42 }
 0xb19   : > { %v1923_v44 = vpop.xlane.xlu0 %1922 }
 0xb1a   : > { %v1926_v45 = vadd.f32 1e-05, %v1924_v43  ;;  %v1925_v46 = vmul.f32 0.03125, %v1923_v44 }
 0xb1c   : > { %2768 = vrsqrt.f32 %v1926_v45  ;;  %v1927_v47 = vadd.f32 1e-05, %v1925_v46 }
 0xb1e   : > { %2770 = vrsqrt.f32 %v1927_v47 }
 0xb26   : > { %v2769_v16 = vpop.eup %2768 }
 0xb27   : > { %v1930_v48 = vmul.f32 %v2769_v16, %v1914_v35 }
 0xb28   : > { %v2771_v6 = vpop.eup %2770 }
 0xb29   : > { %v1938_v50 = vmul.f32 %v2374_v5, %v1930_v48  ;;  %v1931_v51 = vmul.f32 %v2771_v6, %v1915_v37  ;;  %1953 = sbr.rel (%p2376_p1) target bundleno = 3082 (0xc0a), region = 124 }
 0xb2b   : > { %v1946_v52 = vadd.f32 %v2375_v49, %v1938_v50  ;;  %v1939_v53 = vmul.f32 %v2374_v5, %v1931_v51 }
 0xb2d   : > { %1948 = vst.msk [vmem:[#allocation2] sm:$0xff] %vm901_vm2, %v1946_v52  ;;  %v1947_v54 = vadd.f32 %v2375_v49, %v1939_v53 }
 0xb2f   : > { %1949 = vst.msk [vmem:[#allocation2 + $0x8] sm:$0xff] %vm901_vm2, %v1947_v54  ;;  %v1954_v58 = vpack.c.bf16 (!%p2376_p1), %v1947_v54, %v1946_v52 }
 0xb31   : > { %2535 = vmatmul.mubr.msk.bf16.vlgmr.msra.gmra.mrb[0].mxu0 %vm901_vm2, %v1954_v58 }
 0xc04   : > { %v2015_v60 = vpop.f32.mrb[0].mxu0 }
 0xc05   : > { %v2016_v61 = vadd.f32 %v2377_v59, %v2015_v60  ;;  %v2536_v62 = vpop.f32.mrb[1].mxu0 }
 0xc06   : > { %v2018_v63 = vpop.f32.mrb[2].mxu0 }
 0xc07   : > { %2022 = vst.msk [vmem:[%s3734_s11] sm:$0xff] %vm901_vm2, %v2016_v61  ;;  %v2019_v0 = vadd.f32 %v2377_v59, %v2018_v63  ;;  %v2537_v1 = vpop.f32.mrb[3].mxu0 }
 0xc09   : > { %2023 = vst.msk [vmem:[%s3734_s11 + $0x8] sm:$0xff] %vm901_vm2, %v2019_v0 }
 0xc0a PF: > { %s4090_s16 = sld [smem:[#allocation35_spill]]  ;;  %s2391_s24 = sshll.u32 %s3170_s25, 8 }
 0xc0b   : > { %s4091_s5 = sld [smem:[#allocation51_spill]]  ;;  %s2038_s8 = sshll.u32 %s3734_s11, 4  ;;  %s3913_s8 = int_to_ptr.vmem [resolvable:$true] %s2038_s8 }
 0xc0c   : > { %s4092_s20 = sand.u32 1, %s3146_s19   ;;  %s3044_s6 = scalar_lea.vmem %s3913_s8, 256 }
 0xc0d   : > { %s3917_s14 = scalar_lea.sflag [#allocation5], %s4092_s20  ;;  %p3045_p2 = scmp.ne.s32.totalorder %s3913_s8, %s3044_s6 }
 0xc0e   : > { %s3205_s25 = smov [#allocation18]  }
 0xc0f   : > { %s3048_s13 = sshll.u32 %s3205_s25, 4  ;;  %s3049_s13 = int_to_ptr.vmem [resolvable:$false] %s3048_s13 }
 0xc10   : > { %p4093_p6 = scmp.ne.s32.totalorder %s4090_s16, 0  ;;  %s3050_s23 = scalar_lea.vmem %s3049_s13, 512 }
 0xc11   : > { %s3910_s7 = scalar_lea.hbm %s4091_s5, %s2391_s24  ;;  %p3051_p10 = scmp.lt.s32.totalorder %s3913_s8, %s3049_s13 }
 0xc12   : > { %p3046_p5 = pnand %p3045_p2, %p4093_p6  ;;  %p3052_p9 = scmp.lt.s32.totalorder %s3050_s23, %s3044_s6 }
 0xc14   : > { %p3047_p8 = pneg %p3046_p5  ;;  %p3053_p3 = por %p3052_p9, %p3051_p10 }
 0xc16   : > { %p3054_p4 = pnand %p3053_p3, %p3047_p8 }
 0xc18   : > { %3057 = shalt.err (!%p3054_p4)
}
 0xc19   : > { %s3058_s11 = scalar_lea.hbm %s3910_s7, 256  ;;  %s3062_s15 = scalar_lea.hbm %s4091_s5, 512 }
 0xc1a   : > { %p3059_p13 = scmp.ne.s32.totalorder %s3910_s7, %s3058_s11  ;;  %p3063_p12 = scmp.lt.u32.totalorder %s3910_s7, %s4091_s5 }
 0xc1b   : > { %p3064_p0 = scmp.lt.u32.totalorder %s3062_s15, %s3058_s11  ;;  %p3066_p2 = scmp.lt.u32.totalorder %s3058_s11, %s3910_s7 }
 0xc1c   : > { %p3060_p7 = pnand %p3059_p13, %p4093_p6 }
 0xc1d   : > { %p3065_p1 = por %p3064_p0, %p3063_p12 }
 0xc1e   : > { %p3061_p11 = pneg %p3060_p7 }
 0xc1f   : > { %p3067_p5 = por %p3066_p2, %p3065_p1 }
 0xc21   : > { %p3068_p8 = pnand %p3067_p5, %p3061_p11 }
 0xc23   : > { %3071 = shalt.err (!%p3068_p8)
}
 0xc24   : > { %s3206_s2 = smov 128   ;;  %s3207_s21 = smov 8  }
 0xc25   : > { %2556 = dma.vmem_to_hbm [thread:$0]  (%p4093_p6), %s3913_s8, 256, %s3910_s7, %s3917_s14, %s3206_s2, %s3206_s2, %s3207_s21  }
 0xc26 PF: > { %s4094_s18 = sld [smem:[#allocation30_spill]]  ;;  %s4095_s27 = sld [smem:[#allocation25_spill]] }
 0xc27   : > { %s4096_s1 = sld [smem:[#allocation36_spill]] }
 0xc2c   : > { %p2591_p10 = scmp.ge.s32.totalorder %s4094_s18, 2  ;;  %s2053_s28 = sand.u32 1, %s4095_s27  }
 0xc2d   : > { %p4097_p9 = scmp.ne.s32.totalorder %s4096_s1, 0  ;;  %s2054_s29 = scalar_lea.sflag [#allocation5], %s2053_s28 }
 0xc2f   : > { %p2587_p3 = pnand %p2591_p10, %p4097_p9 }
 0xc31   : > { %3137 = dma.done.wait (!%p2587_p3), %s2054_s29, 256  }
 0xc32   : > { %3139 = vsyncadd (!%p2587_p3), %s2054_s29, 4294967040  ;;  %s43_s28 = sadd.s32 1, %s4094_s18   ;;  %s4098_s24 = sld [smem:[#allocation26_spill]] }
 0xc33   : > { %p40_p4 = scmp.ge.s32.totalorder %s43_s28, 6   ;;  %s4099_s20 = sld [smem:[#allocation34_spill]] }
 0xc34   : > { %s4100_s16 = sld [smem:[#allocation27_spill]]  ;;  %s4101_s23 = sld [smem:[#allocation33_spill]] }
 0xc35   : > { %s4102_s25 = sld [smem:[#allocation29_spill]]  ;;  %s4103_s17 = sld [smem:[#allocation31_spill]] }
 0xc36   : > { %s4104_s27 = sld [smem:[#allocation32_spill]]  ;;  %s4105_s18 = smov %s3146_s19 }
 0xc37   : > { %s4107_s21 = smov %s3158_s22  ;;  %42 = sbr.rel (!%p40_p4) target bundleno = 33 (0x21), region = 241 }
 0xc38   : > { %s4106_s19 = smov %s4098_s24  ;;  %s4109_s24 = smov %s3174_s26 }
 0xc3a   : > { %s4108_s22 = smov %s4100_s16 }
 0xc3b   : > { %s4110_s26 = smov %s4103_s17 }
 0xc3e   :  { %2059 = vsyncpa [#allocation4], 1 }
 0xc3f   :  { %2061 = vsyncpa [#allocation4 + $0x1], 1 }
 0xc40   :  { %2062 = vsyncpa [#allocation7], 1 }
 0xc41   :  { %2064 = vsyncpa [#allocation7 + $0x1], 1 }
 0xc42   :  { %2065 = vsyncpa [#allocation10], 1 }
 0xc43   :  { %2067 = vsyncpa [#allocation10 + $0x1], 1 }
 0xc44   :  { %2068 = vsyncpa [#allocation13], 1 }
 0xc45   :  { %2070 = vsyncpa [#allocation13 + $0x1], 1 }
 0xc46   :  { %2071 = vsyncpa [#allocation16], 1 }
 0xc47   :  { %2073 = vsyncpa [#allocation16 + $0x1], 1 }
 0xc48   :  { %2074 = vsyncpa [#allocation5], 1 }
 0xc49   :  { %2076 = vsyncpa [#allocation5 + $0x1], 1 }

</bundles_post_ra>
